<compile_context>
chip_gen: v7x
topology: tpu7x:2x2x1
jax: 0.10.0
libtpu: 0.0.40
codegen_flags: <defaults>
</compile_context>

<pallas_src>
import functools

import numpy as np
import jax
import jax.numpy as jnp
from jax import lax
from jax.experimental import pallas as pl
from jax.experimental.pallas import tpu as pltpu

ACTION_LENGTH = 178
H = W = 9          # smallest input giving 4x4 -> 3x3 -> flatten(288), as Linear(32*3*3) implies
CIN = 27
HEAD_N = 256       # fused actor|critic head width (178 + 1, zero padded to a lane-dense 256)


# ---------------------------------------------------------------------------
# Pallas kernel: MobaNet forward for a tile of TB batch elements.
# Pure 2-D MXU matmuls + f32 bias/ReLU; no in-kernel gathers or reshapes.
# ---------------------------------------------------------------------------
def mobanet_kernel(x_ref, w1_ref, b1_ref, w2_ref, b2_ref,
                   wfc_ref, bfc_ref, wh_ref, bh_ref, out_ref):
    # conv1 (block-diagonal over the 16 output positions): (TB, 4096) @ (4096, 256)
    z1 = jnp.dot(x_ref[...], w1_ref[...], preferred_element_type=jnp.float32)
    z1 = jnp.maximum(z1 + b1_ref[...], 0.0).astype(jnp.bfloat16)          # (TB, 256)

    # conv2 + NCHW flatten fused into one dense matmul: (TB, 256) @ (256, 288)
    z2 = jnp.dot(z1, w2_ref[...], preferred_element_type=jnp.float32)
    z2 = jnp.maximum(z2 + b2_ref[...], 0.0).astype(jnp.bfloat16)          # (TB, 288)

    # fully connected 288 -> 256
    h = jnp.dot(z2, wfc_ref[...], preferred_element_type=jnp.float32)
    h = jnp.maximum(h + bfc_ref[...], 0.0).astype(jnp.bfloat16)           # (TB, 256)

    # fused actor|critic head, single lane-dense 256-wide f32 output block
    out_ref[...] = jnp.dot(h, wh_ref[...],
                           preferred_element_type=jnp.float32) + bh_ref[...]


# ---------------------------------------------------------------------------
# Wrapper: layout / weight packing in plain JAX, hot path in one pallas_call.
# ---------------------------------------------------------------------------
def _im2col_conv1(x):
    """x: (B, 9, 9, 27) NHWC -> (B, 4096): position-major, per-position 243
    features in (kh, kw, cin) order, zero-padded to 256."""
    b = x.shape[0]
    patches = []
    for kh in range(3):
        for kw in range(3):
            patches.append(x[:, kh:kh + 7:2, kw:kw + 7:2, :])        # (B, 4, 4, 27)
    cols = jnp.stack(patches, axis=3)                                # (B, 4, 4, 9, 27)
    cols = cols.reshape(b, 16, 9 * CIN)                              # row p1 = i*4 + j
    cols = jnp.pad(cols, ((0, 0), (0, 0), (0, 256 - 9 * CIN)))       # pad K 243 -> 256
    return cols.reshape(b, 16 * 256)                                 # col = p1*256 + k


@functools.partial(jax.jit, static_argnames=("block_b",))
def mobanet_forward(x, params, block_b=128):
    b = x.shape[0]
    if b <= block_b:
        tb, nblk = b, 1
    else:
        tb = max(8, (block_b // 8) * 8)      # keep output block sublane-aligned
        nblk = -(-b // tb)
    b_pad = tb * nblk
    if b_pad != b:
        x = jnp.pad(x, ((0, b_pad - b), (0, 0), (0, 0), (0, 0)))

    # activations: im2col'd conv1 input, bf16 to halve HBM read bytes
    xcol = _im2col_conv1(x.astype(jnp.float32)).astype(jnp.bfloat16)  # (b_pad, 4096)

    # conv1 weight: (cout,cin,kh,kw) -> (243,16) in (kh,kw,cin) row order, pad K to 256,
    # then block-diagonal over the 16 output positions -> (4096, 256), cols = p1*16 + c1.
    w1 = jnp.transpose(params["conv1_w"], (2, 3, 1, 0)).reshape(9 * CIN, 16)
    w1 = jnp.pad(w1, ((0, 256 - 9 * CIN), (0, 0)))
    w1big = jax.scipy.linalg.block_diag(*([w1] * 16)).astype(jnp.bfloat16)   # (4096, 256)
    b1big = jnp.tile(params["conv1_b"], 16).reshape(1, 256).astype(jnp.float32)

    # conv2 + flatten fused: dense (256, 288) weight (rows p1*16+c1, cols p2*32+c2).
    w2 = params["conv2_w"]                                           # (32, 16, 2, 2)
    w2big = jnp.zeros((256, 9 * 32), jnp.float32)
    for i2 in range(3):
        for j2 in range(3):
            p2 = i2 * 3 + j2
            for dh in range(2):
                for dw in range(2):
                    p1 = (i2 + dh) * 4 + (j2 + dw)
                    w2big = w2big.at[p1 * 16:(p1 + 1) * 16,
                                     p2 * 32:(p2 + 1) * 32].set(w2[:, :, dh, dw].T)
    w2big = w2big.astype(jnp.bfloat16)
    b2big = jnp.tile(params["conv2_b"], 9).reshape(1, 288).astype(jnp.float32)

    # fc: reorder input features from NCHW flatten (c*9 + p2) to our (p2*32 + c) order.
    wfc = jnp.transpose(params["fc_w"].reshape(256, 32, 9), (2, 1, 0)).reshape(288, 256)
    wfc = wfc.astype(jnp.bfloat16)
    bfc = params["fc_b"].reshape(1, 256).astype(jnp.float32)

    # fused actor|critic head, zero-padded to a lane-dense 256-wide output.
    wh = jnp.concatenate([params["actor_w"].T, params["critic_w"].T], axis=1)  # (256, 179)
    wh = jnp.pad(wh, ((0, 0), (0, HEAD_N - wh.shape[1]))).astype(jnp.bfloat16)
    bh = jnp.concatenate(
        [params["actor_b"], params["critic_b"],
         jnp.zeros((HEAD_N - ACTION_LENGTH - 1,), jnp.float32)]).reshape(1, HEAD_N)

    out = pl.pallas_call(
        mobanet_kernel,
        out_shape=jax.ShapeDtypeStruct((b_pad, HEAD_N), jnp.float32),
        grid=(nblk,),
        in_specs=[
            pl.BlockSpec((tb, 16 * 256), lambda i: (i, 0)),          # activations
            pl.BlockSpec((16 * 256, 256), lambda i: (0, 0)),         # w1 (resident)
            pl.BlockSpec((1, 256), lambda i: (0, 0)),
            pl.BlockSpec((256, 288), lambda i: (0, 0)),              # w2 (resident)
            pl.BlockSpec((1, 288), lambda i: (0, 0)),
            pl.BlockSpec((288, 256), lambda i: (0, 0)),              # fc (resident)
            pl.BlockSpec((1, 256), lambda i: (0, 0)),
            pl.BlockSpec((256, HEAD_N), lambda i: (0, 0)),           # head (resident)
            pl.BlockSpec((1, HEAD_N), lambda i: (0, 0)),
        ],
        out_specs=pl.BlockSpec((tb, HEAD_N), lambda i: (i, 0)),
        compiler_params=pltpu.CompilerParams(
            dimension_semantics=("parallel",)),                      # lets v7x split steps across TCs
    )(xcol, w1big, b1big, w2big, b2big, wfc, bfc, wh, bh)

    return out[:b, :ACTION_LENGTH], out[:b, ACTION_LENGTH:ACTION_LENGTH + 1]


# ---------------------------------------------------------------------------
# Deterministic parameter init (mirrors layer_init: orthogonal weight, 0 bias).
# ---------------------------------------------------------------------------
def orthogonal_init(key, shape, gain):
    rows = shape[0]
    cols = int(np.prod(shape[1:]))
    flat = (rows, cols) if rows >= cols else (cols, rows)
    a = jax.random.normal(key, flat, dtype=jnp.float32)
    q, r = jnp.linalg.qr(a)
    q = q * jnp.sign(jnp.diagonal(r))[None, :]
    if rows < cols:
        q = q.T
    return (gain * q).reshape(shape).astype(jnp.float32)


def init_params(key):
    ks = jax.random.split(key, 5)
    g = float(np.sqrt(2.0))
    return {
        "conv1_w": orthogonal_init(ks[0], (16, CIN, 3, 3), g),
        "conv1_b": jnp.zeros((16,), jnp.float32),
        "conv2_w": orthogonal_init(ks[1], (32, 16, 2, 2), g),
        "conv2_b": jnp.zeros((32,), jnp.float32),
        "fc_w": orthogonal_init(ks[2], (256, 32 * 3 * 3), g),
        "fc_b": jnp.zeros((256,), jnp.float32),
        "actor_w": orthogonal_init(ks[3], (ACTION_LENGTH, 256), 0.01),
        "actor_b": jnp.zeros((ACTION_LENGTH,), jnp.float32),
        "critic_w": orthogonal_init(ks[4], (1, 256), 1.0),
        "critic_b": jnp.zeros((1,), jnp.float32),
    }


# ---------------------------------------------------------------------------
# Pure-JAX f32 reference (matches PyTorch NCHW semantics) for correctness.
# ---------------------------------------------------------------------------
def reference_forward(x, p):
    xn = jnp.transpose(x, (0, 3, 1, 2))                              # NCHW
    dn = ("NCHW", "OIHW", "NCHW")
    y = lax.conv_general_dilated(xn, p["conv1_w"], (2, 2), "VALID",
                                 dimension_numbers=dn)
    y = jnp.maximum(y + p["conv1_b"][None, :, None, None], 0.0)
    y = lax.conv_general_dilated(y, p["conv2_w"], (1, 1), "VALID",
                                 dimension_numbers=dn)
    y = jnp.maximum(y + p["conv2_b"][None, :, None, None], 0.0)
    y = y.reshape(y.shape[0], -1)                                    # NCHW flatten (c, h, w)
    h = jnp.maximum(y @ p["fc_w"].T + p["fc_b"], 0.0)
    return h @ p["actor_w"].T + p["actor_b"], h @ p["critic_w"].T + p["critic_b"]


if __name__ == "__main__":
    key = jax.random.PRNGKey(0)
    k_x, k_p = jax.random.split(key)
    params = init_params(k_p)

    # small demo batch (single grid step)
    B = 2
    x = jax.random.normal(k_x, (B, H, W, CIN), dtype=jnp.float32)    # NHWC, as the module expects
    actor, critic = mobanet_forward(x, params)
    jax.block_until_ready((actor, critic))

    ref_actor, ref_critic = reference_forward(x, params)
    np.testing.assert_allclose(np.asarray(actor), np.asarray(ref_actor),
                               rtol=5e-2, atol=5e-2)
    np.testing.assert_allclose(np.asarray(critic), np.asarray(ref_critic),
                               rtol=5e-2, atol=5e-2)
    assert actor.shape == (B, ACTION_LENGTH) and critic.shape == (B, 1)

    # exercise the batch-tiled multi-step grid path (padding + resident weights)
    B2 = 20
    x2 = jax.random.normal(k_x, (B2, H, W, CIN), dtype=jnp.float32)
    actor2, critic2 = mobanet_forward(x2, params, block_b=8)         # grid=(3,), tb=8, b padded to 24
    jax.block_until_ready((actor2, critic2))
    ref_actor2, ref_critic2 = reference_forward(x2, params)
    np.testing.assert_allclose(np.asarray(actor2), np.asarray(ref_actor2),
                               rtol=5e-2, atol=5e-2)
    np.testing.assert_allclose(np.asarray(critic2), np.asarray(ref_critic2),
                               rtol=5e-2, atol=5e-2)
    assert actor2.shape == (B2, ACTION_LENGTH) and critic2.shape == (B2, 1)

    print("KERNEL_OK")
</pallas_src>

<mosaic_0001>
module attributes {stable_mosaic.version = 11 : i64} {
  func.func @mobanet_kernel(%arg0: i32, %arg1: memref<2x4096xbf16, #tpu.memory_space<vmem>>, %arg2: memref<4096x256xbf16, #tpu.memory_space<vmem>>, %arg3: memref<1x256xf32, #tpu.memory_space<vmem>>, %arg4: memref<256x288xbf16, #tpu.memory_space<vmem>>, %arg5: memref<1x288xf32, #tpu.memory_space<vmem>>, %arg6: memref<288x256xbf16, #tpu.memory_space<vmem>>, %arg7: memref<1x256xf32, #tpu.memory_space<vmem>>, %arg8: memref<256x256xbf16, #tpu.memory_space<vmem>>, %arg9: memref<1x256xf32, #tpu.memory_space<vmem>>, %arg10: memref<2x256xf32, #tpu.memory_space<vmem>>) attributes {dimension_semantics = [#tpu.dimension_semantics<parallel>], iteration_bounds = array<i64: 1>, scalar_prefetch = 0 : i64, scratch_operands = 0 : i64, tpu.core_type = #tpu.core_type<tc>, window_params = [{transform_indices = @transform_0, window_bounds = array<i64: 2, 4096>}, {pipeline_mode = #tpu.pipeline_mode<synchronous>, transform_indices = @transform_1, window_bounds = array<i64: 4096, 256>}, {pipeline_mode = #tpu.pipeline_mode<synchronous>, transform_indices = @transform_2, window_bounds = array<i64: 1, 256>}, {pipeline_mode = #tpu.pipeline_mode<synchronous>, transform_indices = @transform_3, window_bounds = array<i64: 256, 288>}, {pipeline_mode = #tpu.pipeline_mode<synchronous>, transform_indices = @transform_4, window_bounds = array<i64: 1, 288>}, {pipeline_mode = #tpu.pipeline_mode<synchronous>, transform_indices = @transform_5, window_bounds = array<i64: 288, 256>}, {pipeline_mode = #tpu.pipeline_mode<synchronous>, transform_indices = @transform_6, window_bounds = array<i64: 1, 256>}, {pipeline_mode = #tpu.pipeline_mode<synchronous>, transform_indices = @transform_7, window_bounds = array<i64: 256, 256>}, {pipeline_mode = #tpu.pipeline_mode<synchronous>, transform_indices = @transform_8, window_bounds = array<i64: 1, 256>}, {transform_indices = @transform_9, window_bounds = array<i64: 2, 256>}]} {
    %c0 = arith.constant 0 : index
    %c0_0 = arith.constant 0 : index
    %0 = vector.load %arg1[%c0, %c0_0] : memref<2x4096xbf16, #tpu.memory_space<vmem>>, vector<2x4096xbf16>
    %c0_1 = arith.constant 0 : index
    %c0_2 = arith.constant 0 : index
    %1 = vector.load %arg2[%c0_1, %c0_2] : memref<4096x256xbf16, #tpu.memory_space<vmem>>, vector<4096x256xbf16>
    %cst = arith.constant dense<0.000000e+00> : vector<2x256xf32>
    %2 = tpu.matmul %0, %1, %cst {dimension_numbers = #tpu.dot_dimension_numbers<[1], [0], [0], [1], [0, 0, 1, 1], [], []>} : vector<2x4096xbf16>, vector<4096x256xbf16>, vector<2x256xf32> -> vector<2x256xf32>
    %c0_3 = arith.constant 0 : index
    %c0_4 = arith.constant 0 : index
    %3 = vector.load %arg3[%c0_3, %c0_4] : memref<1x256xf32, #tpu.memory_space<vmem>>, vector<1x256xf32>
    %4 = vector.broadcast %3 : vector<1x256xf32> to vector<2x256xf32>
    %5 = arith.addf %2, %4 : vector<2x256xf32>
    %cst_5 = arith.constant 0.000000e+00 : f32
    %6 = vector.broadcast %cst_5 : f32 to vector<2x256xf32>
    %7 = arith.maximumf %5, %6 : vector<2x256xf32>
    %8 = arith.truncf %7 : vector<2x256xf32> to vector<2x256xbf16>
    %c0_6 = arith.constant 0 : index
    %c0_7 = arith.constant 0 : index
    %9 = vector.load %arg4[%c0_6, %c0_7] : memref<256x288xbf16, #tpu.memory_space<vmem>>, vector<256x288xbf16>
    %cst_8 = arith.constant dense<0.000000e+00> : vector<2x288xf32>
    %10 = tpu.matmul %8, %9, %cst_8 {dimension_numbers = #tpu.dot_dimension_numbers<[1], [0], [0], [1], [0, 0, 1, 1], [], []>} : vector<2x256xbf16>, vector<256x288xbf16>, vector<2x288xf32> -> vector<2x288xf32>
    %c0_9 = arith.constant 0 : index
    %c0_10 = arith.constant 0 : index
    %11 = vector.load %arg5[%c0_9, %c0_10] : memref<1x288xf32, #tpu.memory_space<vmem>>, vector<1x288xf32>
    %12 = vector.broadcast %11 : vector<1x288xf32> to vector<2x288xf32>
    %13 = arith.addf %10, %12 : vector<2x288xf32>
    %cst_11 = arith.constant 0.000000e+00 : f32
    %14 = vector.broadcast %cst_11 : f32 to vector<2x288xf32>
    %15 = arith.maximumf %13, %14 : vector<2x288xf32>
    %16 = arith.truncf %15 : vector<2x288xf32> to vector<2x288xbf16>
    %c0_12 = arith.constant 0 : index
    %c0_13 = arith.constant 0 : index
    %17 = vector.load %arg6[%c0_12, %c0_13] : memref<288x256xbf16, #tpu.memory_space<vmem>>, vector<288x256xbf16>
    %cst_14 = arith.constant dense<0.000000e+00> : vector<2x256xf32>
    %18 = tpu.matmul %16, %17, %cst_14 {dimension_numbers = #tpu.dot_dimension_numbers<[1], [0], [0], [1], [0, 0, 1, 1], [], []>} : vector<2x288xbf16>, vector<288x256xbf16>, vector<2x256xf32> -> vector<2x256xf32>
    %c0_15 = arith.constant 0 : index
    %c0_16 = arith.constant 0 : index
    %19 = vector.load %arg7[%c0_15, %c0_16] : memref<1x256xf32, #tpu.memory_space<vmem>>, vector<1x256xf32>
    %20 = vector.broadcast %19 : vector<1x256xf32> to vector<2x256xf32>
    %21 = arith.addf %18, %20 : vector<2x256xf32>
    %cst_17 = arith.constant 0.000000e+00 : f32
    %22 = vector.broadcast %cst_17 : f32 to vector<2x256xf32>
    %23 = arith.maximumf %21, %22 : vector<2x256xf32>
    %24 = arith.truncf %23 : vector<2x256xf32> to vector<2x256xbf16>
    %c0_18 = arith.constant 0 : index
    %c0_19 = arith.constant 0 : index
    %25 = vector.load %arg8[%c0_18, %c0_19] : memref<256x256xbf16, #tpu.memory_space<vmem>>, vector<256x256xbf16>
    %cst_20 = arith.constant dense<0.000000e+00> : vector<2x256xf32>
    %26 = tpu.matmul %24, %25, %cst_20 {dimension_numbers = #tpu.dot_dimension_numbers<[1], [0], [0], [1], [0, 0, 1, 1], [], []>} : vector<2x256xbf16>, vector<256x256xbf16>, vector<2x256xf32> -> vector<2x256xf32>
    %c0_21 = arith.constant 0 : index
    %c0_22 = arith.constant 0 : index
    %27 = vector.load %arg9[%c0_21, %c0_22] : memref<1x256xf32, #tpu.memory_space<vmem>>, vector<1x256xf32>
    %28 = vector.broadcast %27 : vector<1x256xf32> to vector<2x256xf32>
    %29 = arith.addf %26, %28 : vector<2x256xf32>
    %c0_23 = arith.constant 0 : index
    %c0_24 = arith.constant 0 : index
    %30 = vector.load %arg10[%c0_23, %c0_24] : memref<2x256xf32, #tpu.memory_space<vmem>>, vector<2x256xf32>
    tpu.vector_store %arg10[%c0_23, %c0_24], %29 {strides = array<i32>} : memref<2x256xf32, #tpu.memory_space<vmem>>, vector<2x256xf32>,
    return
  }
  func.func @transform_0(%arg0: i32) -> (i32, i32) {
    %c0_i32 = arith.constant 0 : i32
    %c0_i32_0 = arith.constant 0 : i32
    return %arg0, %c0_i32 : i32, i32
  }
  func.func @transform_1(%arg0: i32) -> (i32, i32) {
    %c0_i32 = arith.constant 0 : i32
    %c0_i32_0 = arith.constant 0 : i32
    %c0_i32_1 = arith.constant 0 : i32
    return %c0_i32, %c0_i32_0 : i32, i32
  }
  func.func @transform_2(%arg0: i32) -> (i32, i32) {
    %c0_i32 = arith.constant 0 : i32
    %c0_i32_0 = arith.constant 0 : i32
    %c0_i32_1 = arith.constant 0 : i32
    return %c0_i32, %c0_i32_0 : i32, i32
  }
  func.func @transform_3(%arg0: i32) -> (i32, i32) {
    %c0_i32 = arith.constant 0 : i32
    %c0_i32_0 = arith.constant 0 : i32
    %c0_i32_1 = arith.constant 0 : i32
    return %c0_i32, %c0_i32_0 : i32, i32
  }
  func.func @transform_4(%arg0: i32) -> (i32, i32) {
    %c0_i32 = arith.constant 0 : i32
    %c0_i32_0 = arith.constant 0 : i32
    %c0_i32_1 = arith.constant 0 : i32
    return %c0_i32, %c0_i32_0 : i32, i32
  }
  func.func @transform_5(%arg0: i32) -> (i32, i32) {
    %c0_i32 = arith.constant 0 : i32
    %c0_i32_0 = arith.constant 0 : i32
    %c0_i32_1 = arith.constant 0 : i32
    return %c0_i32, %c0_i32_0 : i32, i32
  }
  func.func @transform_6(%arg0: i32) -> (i32, i32) {
    %c0_i32 = arith.constant 0 : i32
    %c0_i32_0 = arith.constant 0 : i32
    %c0_i32_1 = arith.constant 0 : i32
    return %c0_i32, %c0_i32_0 : i32, i32
  }
  func.func @transform_7(%arg0: i32) -> (i32, i32) {
    %c0_i32 = arith.constant 0 : i32
    %c0_i32_0 = arith.constant 0 : i32
    %c0_i32_1 = arith.constant 0 : i32
    return %c0_i32, %c0_i32_0 : i32, i32
  }
  func.func @transform_8(%arg0: i32) -> (i32, i32) {
    %c0_i32 = arith.constant 0 : i32
    %c0_i32_0 = arith.constant 0 : i32
    %c0_i32_1 = arith.constant 0 : i32
    return %c0_i32, %c0_i32_0 : i32, i32
  }
  func.func @transform_9(%arg0: i32) -> (i32, i32) {
    %c0_i32 = arith.constant 0 : i32
    %c0_i32_0 = arith.constant 0 : i32
    return %arg0, %c0_i32 : i32, i32
  }
}

</mosaic_0001>

<bundles_post_ra>
// kernel: tile.19
= control target key start
LH: loop header
LB: loop body
LE: loop exit
PB: predicated region body
PF: predicated region fallthrough
CT: control target
= control target key end

     0   :  { %s6_s6 = smov 3  ;;  %s13_s11 = smov 3  ;;  %vm3_vm0 = vcmask 261120   ;;  %vm10_vm1 = vcmask 1048320   ;;  %vm17_vm2 = vcmask 785920   ;;  %vm24_vm3 = vcmask 523520   ;;  %s86_s0 = inlined_call_operand.vmem [shape: f32[9,32], index: 0, kind: input, shape index: {}]   ;;  %s87_s1 = inlined_call_operand.vmem [shape: f32[1,288], index: 1, kind: output, shape index: {}]  }
   0x1   :  { %v2_v0 = vld [vmem:[%s86_s0] ss:$4 sm:$0x7]   ;;  %v44_v1 = vld [vmem:[%s86_s0 + $0x3] ss:$4 sm:%s6_s6]   ;;  %s52_s12 = smov 96  }
   0x2   :  { %8 = vrot.lane.b32.xlu0 %v44_v1, %s52_s12  ;;  %s20_s13 = smov 3  ;;  %4 = vst.msk [vmem:[#allocation0] ss:$8 sm:$0x7] %vm3_vm0, %v2_v0   ;;  %v45_v2 = vld [vmem:[%s86_s0 + $0x2] ss:$4 sm:%s13_s11]  }
   0x3   :  { %v46_v3 = vld [vmem:[%s86_s0 + $0x1] ss:$4 sm:%s20_s13]   ;;  %s53_s0 = smov 32   ;;  %s54_s18 = smov 64  }
   0x4   :  { %22 = vrot.lane.b32.xlu1 %v46_v3, %s53_s0 }
   0x6   :  { %15 = vrot.lane.b32.xlu0 %v45_v2, %s54_s18 }
   0x9   :  { %v38_v4 = vld [vmem:[#allocation0 + $0x10] sm:$0x1] }
   0xa   :  { %48 = vst [vmem:[%s87_s1 + $0x2] sm:$0x1] %v38_v4 }
  0x74   :  { %v9_v5 = vpop.permute.xlu0 %8  }
  0x75   :  { %11 = vst.msk [vmem:[#allocation0] ss:$8 sm:$0x3] %vm10_vm1, %v9_v5  }
  0x76   :  { %v23_v6 = vpop.permute.xlu1 %22  }
  0x78   :  { %v16_v7 = vpop.permute.xlu0 %15  }
  0x79   :  { %18 = vst.msk [vmem:[#allocation0] ss:$8 sm:$0x3] %vm17_vm2, %v16_v7  }
  0x7a   :  { %25 = vst.msk [vmem:[#allocation0] ss:$8 sm:$0x3] %vm24_vm3, %v23_v6  }
  0x81   :  { %v29_v8 = vld [vmem:[#allocation0] sm:$0x1]  ;;  %v33_v9 = vld [vmem:[#allocation0 + $0x8] sm:$0x1] }
  0x82   :  { %31 = vst [vmem:[%s87_s1] sm:$0x1] %v29_v8  ;;  %47 = vst [vmem:[%s87_s1 + $0x1] sm:$0x1] %v33_v9 }

// kernel: tile.18
= control target key start
LH: loop header
LB: loop body
LE: loop exit
PB: predicated region body
PF: predicated region fallthrough
CT: control target
= control target key end

     0   :  { %s28_s0 = inlined_call_operand.vmem [shape: f32[32], index: 0, kind: input, shape index: {}]   ;;  %s29_s1 = inlined_call_operand.vmem [shape: f32[9,32], index: 1, kind: output, shape index: {}]  }
   0x1   :  { %v4_v0 = vld [vmem:[%s28_s0] ss:$0 sm:$0xff] }
   0x2   :  { %5 = vst [vmem:[%s29_s1] sm:$0xff] %v4_v0  ;;  %8 = vst [vmem:[%s29_s1 + $0x8] sm:$0xff] %v4_v0 }

// kernel: tile.13
= control target key start
LH: loop header
LB: loop body
LE: loop exit
PB: predicated region body
PF: predicated region fallthrough
CT: control target
= control target key end

     0   :  { %s28_s0 = inlined_call_operand.vmem [shape: f32[16], index: 0, kind: input, shape index: {}]   ;;  %s29_s1 = inlined_call_operand.vmem [shape: f32[16,16], index: 1, kind: output, shape index: {}]  }
   0x1   :  { %v4_v0 = vld [vmem:[%s28_s0] ss:$0 sm:$0xff] }
   0x2   :  { %5 = vst [vmem:[%s29_s1] sm:$0xff] %v4_v0  ;;  %8 = vst [vmem:[%s29_s1 + $0x8] sm:$0xff] %v4_v0 }

// kernel: tile.14
= control target key start
LH: loop header
LB: loop body
LE: loop exit
PB: predicated region body
PF: predicated region fallthrough
CT: control target
= control target key end

     0   :  { %s7_s6 = smov 3  ;;  %s21_s9 = smov 3  ;;  %vm4_vm0 = vcmask 130048   ;;  %vm11_vm1 = vcmask 1048448   ;;  %vm18_vm2 = vcmask 917248   ;;  %vm25_vm3 = vcmask 786048   ;;  %s128_s0 = inlined_call_operand.vmem [shape: f32[16,16], index: 0, kind: input, shape index: {}]   ;;  %s129_s1 = inlined_call_operand.vmem [shape: f32[1,256], index: 1, kind: output, shape index: {}]  }
   0x1   :  { %v66_v0 = vld [vmem:[%s128_s0 + $0x7] ss:$8 sm:%s7_s6]   ;;  %s81_s10 = smov 112   ;;  %v68_v1 = vld [vmem:[%s128_s0 + $0x5] ss:$8 sm:%s21_s9]   ;;  %s14_s13 = smov 3 }
   0x2   :  { %9 = vrot.lane.b32.xlu0 %v66_v0, %s81_s10  ;;  %s82_s14 = smov 80   ;;  %v67_v2 = vld [vmem:[%s128_s0 + $0x6] ss:$8 sm:%s14_s13]   ;;  %s28_s17 = smov 3  ;;  %vm32_vm4 = vcmask 654848   ;;  %vm39_vm5 = vcmask 523648  }
   0x3   :  { %23 = vrot.lane.b32.xlu1 %v68_v1, %s82_s14  ;;  %v69_v3 = vld [vmem:[%s128_s0 + $0x4] ss:$8 sm:%s28_s17]   ;;  %s35_s20 = smov 3  ;;  %s42_s21 = smov 3  ;;  %vm46_vm6 = vcmask 392448   ;;  %vm53_vm7 = vcmask 261248  }
   0x4   :  { %s83_s22 = smov 96   ;;  %s84_s23 = smov 64   ;;  %v70_v4 = vld [vmem:[%s128_s0 + $0x3] ss:$8 sm:%s35_s20]   ;;  %v71_v5 = vld [vmem:[%s128_s0 + $0x2] ss:$8 sm:%s42_s21]  }
   0x5   :  { %s2_s26 = smov 3  ;;  %s49_s29 = smov 3 }
   0x6   :  { %16 = vrot.lane.b32.xlu0 %v67_v2, %s83_s22  ;;  %v3_v6 = vld [vmem:[%s128_s0] ss:$8 sm:%s2_s26]   ;;  %s85_s3 = smov 48   ;;  %s86_s4 = smov 32  }
   0x7   :  { %30 = vrot.lane.b32.xlu1 %v69_v3, %s84_s23  ;;  %5 = vst.msk [vmem:[#allocation0] ss:$8 sm:$0x3] %vm4_vm0, %v3_v6   ;;  %v72_v7 = vld [vmem:[%s128_s0 + $0x1] ss:$8 sm:%s49_s29]   ;;  %s87_s0 = smov 16  }
   0xa   :  { %37 = vrot.lane.b32.xlu0 %v70_v4, %s85_s3 }
   0xb   :  { %44 = vrot.lane.b32.xlu1 %v71_v5, %s86_s4 }
   0xe   :  { %51 = vrot.lane.b32.xlu0 %v72_v7, %s87_s0 }
  0x74   :  { %v10_v8 = vpop.permute.xlu0 %9  }
  0x75   :  { %12 = vst.msk [vmem:[#allocation0] ss:$8 sm:$0x3] %vm11_vm1, %v10_v8   ;;  %v24_v9 = vpop.permute.xlu1 %23  }
  0x78   :  { %v17_v10 = vpop.permute.xlu0 %16  }
  0x79   :  { %19 = vst.msk [vmem:[#allocation0] ss:$8 sm:$0x3] %vm18_vm2, %v17_v10   ;;  %v31_v11 = vpop.permute.xlu1 %30  }
  0x7a   :  { %26 = vst.msk [vmem:[#allocation0] ss:$8 sm:$0x3] %vm25_vm3, %v24_v9  }
  0x7b   :  { %33 = vst.msk [vmem:[#allocation0] ss:$8 sm:$0x3] %vm32_vm4, %v31_v11  }
  0x7c   :  { %v38_v12 = vpop.permute.xlu0 %37  }
  0x7d   :  { %40 = vst.msk [vmem:[#allocation0] ss:$8 sm:$0x3] %vm39_vm5, %v38_v12   ;;  %v45_v13 = vpop.permute.xlu1 %44  }
  0x7e   :  { %47 = vst.msk [vmem:[#allocation0] ss:$8 sm:$0x3] %vm46_vm6, %v45_v13  }
  0x80   :  { %v52_v14 = vpop.permute.xlu0 %51  }
  0x81   :  { %54 = vst.msk [vmem:[#allocation0] ss:$8 sm:$0x3] %vm53_vm7, %v52_v14  }
  0x88   :  { %v58_v15 = vld [vmem:[#allocation0] sm:$0x1]  ;;  %v62_v16 = vld [vmem:[#allocation0 + $0x8] sm:$0x1] }
  0x89   :  { %60 = vst [vmem:[%s129_s1] sm:$0x1] %v58_v15  ;;  %73 = vst [vmem:[%s129_s1 + $0x1] sm:$0x1] %v62_v16 }

// kernel: mobanet_forward.1
= control target key start
LH: loop header
LB: loop body
LE: loop exit
PB: predicated region body
PF: predicated region fallthrough
CT: control target
= control target key end

     0   :  { %v551_v36 = vlaneseq  ;;  %v6676_v37 = vmov 1966171168   ;;  %vm4665_vm0 = vcmask 261120   ;;  %s8806_s1 = inlined_call_operand.vmem [shape: bf16[4096,256], index: 1, kind: input, shape index: {}]   ;;  %s8807_s0 = inlined_call_operand.vmem [shape: bf16[2,4096], index: 0, kind: input, shape index: {}]   ;;  %s8808_s3 = inlined_call_operand.vmem [shape: bf16[256,288], index: 3, kind: input, shape index: {}]   ;;  %s8809_s5 = inlined_call_operand.vmem [shape: bf16[288,256], index: 5, kind: input, shape index: {}]   ;;  %s8810_s2 = inlined_call_operand.vmem [shape: f32[1,256], index: 2, kind: input, shape index: {}]   ;;  %s8811_s7 = inlined_call_operand.vmem [shape: bf16[256,256], index: 7, kind: input, shape index: {}]   ;;  %s8812_s4 = inlined_call_operand.vmem [shape: f32[1,288], index: 4, kind: input, shape index: {}]   ;;  %s8813_s6 = inlined_call_operand.vmem [shape: f32[1,256], index: 6, kind: input, shape index: {}]   ;;  %s8814_s8 = inlined_call_operand.vmem [shape: f32[1,256], index: 8, kind: input, shape index: {}]   ;;  %s8815_s9 = inlined_call_operand.vmem [shape: f32[2,256], index: 9, kind: output, shape index: {}]  }
   0x1   :  { %v5736_v0 = vld [vmem:[%s8806_s1 + $0x4] ss:$8 sps:$4 sm:$0xff]   ;;  %v5740_v2 = vld [vmem:[%s8806_s1] ss:$8 sps:$4 sm:$0xff]   ;;  %v5742_v4 = vld [vmem:[%s8806_s1 + $0x14] ss:$8 sps:$4 sm:$0xff]   ;;  %v567_v38 = vunpack.c.l.s4 %v6676_v37 }
   0x2   :  { %v5738_v1 = vld [vmem:[%s8806_s1 + $0x604] ss:$8 sps:$4 sm:$0xff]   ;;  %3353 = vmatprep.subr.bf16.mxu1 %v5736_v0  ;;  %v5741_v3 = vld [vmem:[%s8806_s1 + $0x600] ss:$8 sps:$4 sm:$0xff]   ;;  %v5744_v5 = vld [vmem:[%s8806_s1 + $0x614] ss:$8 sps:$4 sm:$0xff]  }
   0x3   :  { %3599 = vmatprep.subr.bf16.mxu0 %v5738_v1  ;;  %3354 = vmatpush1.bf16.msra.mxu1 %v5740_v2  ;;  %v5746_v6 = vld [vmem:[%s8806_s1 + $0x10] ss:$8 sps:$4 sm:$0xff]   ;;  %v5748_v8 = vld [vmem:[%s8806_s1 + $0x24] ss:$8 sps:$4 sm:$0xff]   ;;  %v5752_v10 = vld [vmem:[%s8806_s1 + $0x20] ss:$8 sps:$4 sm:$0xff]   ;;  %v568_v43 = vunpack.c.0.s8 %v567_v38 }
   0x4   :  { %3600 = vmatpush1.bf16.msra.mxu0 %v5741_v3  ;;  %3355 = vmatprep.subr.bf16.mxu1 %v5742_v4  ;;  %v5747_v7 = vld [vmem:[%s8806_s1 + $0x610] ss:$8 sps:$4 sm:$0xff]   ;;  %v5750_v9 = vld [vmem:[%s8806_s1 + $0x624] ss:$8 sps:$4 sm:$0xff]   ;;  %v5753_v11 = vld [vmem:[%s8806_s1 + $0x620] ss:$8 sps:$4 sm:$0xff]  }
   0x5   :  { %3601 = vmatprep.subr.bf16.mxu0 %v5744_v5  ;;  %v5754_v12 = vld [vmem:[%s8806_s1 + $0x34] ss:$8 sps:$4 sm:$0xff]   ;;  %v5758_v14 = vld [vmem:[%s8806_s1 + $0x30] ss:$8 sps:$4 sm:$0xff]   ;;  %v5760_v16 = vld [vmem:[%s8806_s1 + $0x44] ss:$8 sps:$4 sm:$0xff]  }
   0x6   :  { %v5756_v13 = vld [vmem:[%s8806_s1 + $0x634] ss:$8 sps:$4 sm:$0xff]   ;;  %v5759_v15 = vld [vmem:[%s8806_s1 + $0x630] ss:$8 sps:$4 sm:$0xff]   ;;  %v5762_v17 = vld [vmem:[%s8806_s1 + $0x644] ss:$8 sps:$4 sm:$0xff]  }
   0x7   :  { %3356 = vmatpush1.bf16.msra.mxu1 %v5746_v6  ;;  %v5764_v18 = vld [vmem:[%s8806_s1 + $0x40] ss:$8 sps:$4 sm:$0xff]   ;;  %v5766_v20 = vld [vmem:[%s8806_s1 + $0x54] ss:$8 sps:$4 sm:$0xff]   ;;  %v5770_v22 = vld [vmem:[%s8806_s1 + $0x50] ss:$8 sps:$4 sm:$0xff]  }
   0x8   :  { %3602 = vmatpush1.bf16.msra.mxu0 %v5747_v7  ;;  %3357 = vmatprep.subr.bf16.mxu1 %v5748_v8  ;;  %v5765_v19 = vld [vmem:[%s8806_s1 + $0x640] ss:$8 sps:$4 sm:$0xff]   ;;  %v5768_v21 = vld [vmem:[%s8806_s1 + $0x654] ss:$8 sps:$4 sm:$0xff]   ;;  %v5771_v23 = vld [vmem:[%s8806_s1 + $0x650] ss:$8 sps:$4 sm:$0xff]  }
   0x9   :  { %3603 = vmatprep.subr.bf16.mxu0 %v5750_v9  ;;  %v5772_v24 = vld [vmem:[%s8806_s1 + $0x64] ss:$8 sps:$4 sm:$0xff]   ;;  %v5776_v26 = vld [vmem:[%s8806_s1 + $0x60] ss:$8 sps:$4 sm:$0xff]   ;;  %v5778_v28 = vld [vmem:[%s8806_s1 + $0x74] ss:$8 sps:$4 sm:$0xff]  }
   0xa   :  { %v5774_v25 = vld [vmem:[%s8806_s1 + $0x664] ss:$8 sps:$4 sm:$0xff]   ;;  %v5777_v27 = vld [vmem:[%s8806_s1 + $0x660] ss:$8 sps:$4 sm:$0xff]   ;;  %v5780_v29 = vld [vmem:[%s8806_s1 + $0x674] ss:$8 sps:$4 sm:$0xff]  }
   0xb   :  { %3358 = vmatpush1.bf16.msra.mxu1 %v5752_v10  ;;  %v5782_v30 = vld [vmem:[%s8806_s1 + $0x70] ss:$8 sps:$4 sm:$0xff]   ;;  %v5784_v32 = vld [vmem:[%s8806_s1 + $0x84] ss:$8 sps:$4 sm:$0xff]   ;;  %v5788_v34 = vld [vmem:[%s8806_s1 + $0x80] ss:$8 sps:$4 sm:$0xff]  }
   0xc   :  { %3604 = vmatpush1.bf16.msra.mxu0 %v5753_v11  ;;  %3359 = vmatprep.subr.bf16.mxu1 %v5754_v12  ;;  %v5783_v31 = vld [vmem:[%s8806_s1 + $0x670] ss:$8 sps:$4 sm:$0xff]   ;;  %v5786_v33 = vld [vmem:[%s8806_s1 + $0x684] ss:$8 sps:$4 sm:$0xff]   ;;  %v5789_v35 = vld [vmem:[%s8806_s1 + $0x680] ss:$8 sps:$4 sm:$0xff]  }
   0xd   :  { %3605 = vmatprep.subr.bf16.mxu0 %v5756_v13  ;;  %v5790_v39 = vld [vmem:[%s8806_s1 + $0x94] ss:$8 sps:$4 sm:$0xff]   ;;  %v5794_v41 = vld [vmem:[%s8806_s1 + $0x90] ss:$8 sps:$4 sm:$0xff]   ;;  %v6845_v42 = vshrl.u32 %v551_v36, 7  ;;  %v6874_v52 = vld [vmem:[%s8807_s0] sm:$0xff] }
   0xe   :  { %v5792_v40 = vld [vmem:[%s8806_s1 + $0x694] ss:$8 sps:$4 sm:$0xff]   ;;  %v5795_v44 = vld [vmem:[%s8806_s1 + $0x690] ss:$8 sps:$4 sm:$0xff]   ;;  %v5796_v45 = vld [vmem:[%s8806_s1 + $0xa4] ss:$8 sps:$4 sm:$0xff]  }
   0xf   :  { %3360 = vmatpush1.bf16.msra.mxu1 %v5758_v14  ;;  %v5798_v46 = vld [vmem:[%s8806_s1 + $0x6a4] ss:$8 sps:$4 sm:$0xff]   ;;  %v5800_v47 = vld [vmem:[%s8806_s1 + $0xa0] ss:$8 sps:$4 sm:$0xff]   ;;  %v6863_v49 = vsub.s32 %v568_v43, %v6845_v42  ;;  %v5802_v50 = vld [vmem:[%s8806_s1 + $0xb4] ss:$8 sps:$4 sm:$0xff]  }
  0x10   :  { %3606 = vmatpush1.bf16.msra.mxu0 %v5759_v15  ;;  %3361 = vmatprep.subr.bf16.mxu1 %v5760_v16  ;;  %v5801_v48 = vld [vmem:[%s8806_s1 + $0x6a0] ss:$8 sps:$4 sm:$0xff]   ;;  %v5804_v51 = vld [vmem:[%s8806_s1 + $0x6b4] ss:$8 sps:$4 sm:$0xff]   ;;  %v5806_v53 = vld [vmem:[%s8806_s1 + $0xb0] ss:$8 sps:$4 sm:$0xff]  }
  0x11   :  { %3607 = vmatprep.subr.bf16.mxu0 %v5762_v17  ;;  %v572_v54 = vrot.slane %v6874_v52, %v6863_v49  ;;  %v5807_v55 = vld [vmem:[%s8806_s1 + $0x6b0] ss:$8 sps:$4 sm:$0xff]   ;;  %v34_v56 = vld [vmem:[%s8807_s0 + $0x8] sm:$0xff]  ;;  %v5814_v1 = vld [vmem:[%s8806_s1 + $0xd4] ss:$8 sps:$4 sm:$0xff]  }
  0x12   :  { %v5808_v57 = vld [vmem:[%s8806_s1 + $0xc4] ss:$8 sps:$4 sm:$0xff]   ;;  %v614_v60 = vcombine.high %v34_v56, %v34_v56  ;;  %v5812_v63 = vld [vmem:[%s8806_s1 + $0xc0] ss:$8 sps:$4 sm:$0xff]   ;;  %v5816_v2 = vld [vmem:[%s8806_s1 + $0x6d4] ss:$8 sps:$4 sm:$0xff]  }
  0x13   :  { %3362 = vmatpush1.bf16.msra.mxu1 %v5764_v18  ;;  %v5810_v58 = vld [vmem:[%s8806_s1 + $0x6c4] ss:$8 sps:$4 sm:$0xff]   ;;  %v580_v59 = vcombine.high %v572_v54, %v572_v54  ;;  %v5813_v0 = vld [vmem:[%s8806_s1 + $0x6c0] ss:$8 sps:$4 sm:$0xff]   ;;  %v5818_v5 = vld [vmem:[%s8806_s1 + $0xd0] ss:$8 sps:$4 sm:$0xff]   ;;  %v6945_v17 = vrot.slane %v572_v54, %v6863_v49 }
  0x14   :  { %3608 = vmatpush1.bf16.msra.mxu0 %v5765_v19  ;;  %3363 = vmatprep.subr.bf16.mxu1 %v5766_v20  ;;  %v628_v62 = vrot.slane %v614_v60, %v6863_v49  ;;  %v5819_v6 = vld [vmem:[%s8806_s1 + $0x6d0] ss:$8 sps:$4 sm:$0xff]   ;;  %v5820_v7 = vld [vmem:[%s8806_s1 + $0xe4] ss:$8 sps:$4 sm:$0xff]   ;;  %v5824_v9 = vld [vmem:[%s8806_s1 + $0xe0] ss:$8 sps:$4 sm:$0xff]  }
  0x15   :  { %3609 = vmatprep.subr.bf16.mxu0 %v5768_v21  ;;  %v602_v61 = vrot.slane %v580_v59, %v6863_v49  ;;  %v5822_v8 = vld [vmem:[%s8806_s1 + $0x6e4] ss:$8 sps:$4 sm:$0xff]   ;;  %v5825_v10 = vld [vmem:[%s8806_s1 + $0x6e0] ss:$8 sps:$4 sm:$0xff]   ;;  %v5826_v11 = vld [vmem:[%s8806_s1 + $0xf4] ss:$8 sps:$4 sm:$0xff]  }
  0x16   :  { %v630_v3 = vcombine.high %v628_v62, %v628_v62  ;;  %v5828_v12 = vld [vmem:[%s8806_s1 + $0x6f4] ss:$8 sps:$4 sm:$0xff]   ;;  %v5830_v13 = vld [vmem:[%s8806_s1 + $0xf0] ss:$8 sps:$4 sm:$0xff]   ;;  %v5835_v15 = vld [vmem:[%s8806_s1 + $0x104] ss:$8 sps:$4 sm:$0xff]   ;;  %v6948_v18 = vrot.slane %v628_v62, %v6863_v49 }
  0x17   :  { %3364 = vmatpush1.bf16.msra.mxu1 %v5770_v22  ;;  %3385 = vmatprep.mubr.bf16.mxu1 %v602_v61  ;;  %v5831_v14 = vld [vmem:[%s8806_s1 + $0x6f0] ss:$8 sps:$4 sm:$0xff]   ;;  %v5839_v16 = vld [vmem:[%s8806_s1 + $0x704] ss:$8 sps:$4 sm:$0xff]   ;;  %v5833_v19 = vld [vmem:[%s8806_s1 + $0x100] ss:$8 sps:$4 sm:$0xff]  }
  0x18   :  { %3610 = vmatpush1.bf16.msra.mxu0 %v5771_v23  ;;  %3365 = vmatprep.subr.bf16.mxu1 %v5772_v24  ;;  %v658_v4 = vrot.slane %v630_v3, %v6863_v49  ;;  %v5837_v20 = vld [vmem:[%s8806_s1 + $0x700] ss:$8 sps:$4 sm:$0xff]   ;;  %v5842_v21 = vld [vmem:[%s8806_s1 + $0x114] ss:$8 sps:$4 sm:$0xff]   ;;  %v612_v23 = vcombine.high %v602_v61, %v602_v61  ;;  %v5863_v36 = vld [vmem:[%s8806_s1 + $0x744] ss:$8 sps:$4 sm:$0xff]  }
  0x19   :  { %3611 = vmatprep.subr.bf16.mxu0 %v5774_v25  ;;  %v5845_v22 = vld [vmem:[%s8806_s1 + $0x714] ss:$8 sps:$4 sm:$0xff]   ;;  %v5840_v25 = vld [vmem:[%s8806_s1 + $0x110] ss:$8 sps:$4 sm:$0xff]   ;;  %v5858_v37 = vld [vmem:[%s8806_s1 + $0x140] ss:$8 sps:$4 sm:$0xff]  }
  0x1a   :  { %3631 = vmatprep.mubr.bf16.mxu0 %v658_v4  ;;  %v662_v24 = vcombine.high %v658_v4, %v658_v4  ;;  %v5861_v38 = vld [vmem:[%s8806_s1 + $0x740] ss:$8 sps:$4 sm:$0xff]   ;;  %v5867_v43 = vld [vmem:[%s8806_s1 + $0x750] ss:$8 sps:$4 sm:$0xff]   ;;  %v5884_v54 = vld [vmem:[%s8806_s1 + $0x184] ss:$8 sps:$4 sm:$0xff]  }
  0x1b   :  { %3366 = vmatpush1.bf16.msra.mxu1 %v5776_v26  ;;  %v5843_v26 = vld [vmem:[%s8806_s1 + $0x710] ss:$8 sps:$4 sm:$0xff]   ;;  %v5882_v56 = vld [vmem:[%s8806_s1 + $0x180] ss:$8 sps:$4 sm:$0xff]   ;;  %v5893_v59 = vld [vmem:[%s8806_s1 + $0x794] ss:$8 sps:$4 sm:$0xff]  }
  0x1c   :  { %3612 = vmatpush1.bf16.msra.mxu0 %v5777_v27  ;;  %3367 = vmatprep.subr.bf16.mxu1 %v5778_v28  ;;  %v5848_v27 = vld [vmem:[%s8806_s1 + $0x124] ss:$8 sps:$4 sm:$0xff]   ;;  %v5888_v60 = vld [vmem:[%s8806_s1 + $0x190] ss:$8 sps:$4 sm:$0xff]   ;;  %v5905_v3 = vld [vmem:[%s8806_s1 + $0x7b4] ss:$8 sps:$4 sm:$0xff]  }
  0x1d   :  { %3613 = vmatprep.subr.bf16.mxu0 %v5780_v29  ;;  %v5851_v28 = vld [vmem:[%s8806_s1 + $0x724] ss:$8 sps:$4 sm:$0xff]   ;;  %v5846_v29 = vld [vmem:[%s8806_s1 + $0x120] ss:$8 sps:$4 sm:$0xff]   ;;  %v5891_v61 = vld [vmem:[%s8806_s1 + $0x790] ss:$8 sps:$4 sm:$0xff]  }
  0x1e   :  { %v5896_v62 = vld [vmem:[%s8806_s1 + $0x1a4] ss:$8 sps:$4 sm:$0xff]   ;;  %v5900_v4 = vld [vmem:[%s8806_s1 + $0x1b0] ss:$8 sps:$4 sm:$0xff]  }
  0x1f   :  { %3368 = vmatpush1.bf16.msra.mxu1 %v5782_v30  ;;  %v5849_v30 = vld [vmem:[%s8806_s1 + $0x720] ss:$8 sps:$4 sm:$0xff]  }
  0x20   :  { %3614 = vmatpush1.bf16.msra.mxu0 %v5783_v31  ;;  %3369 = vmatprep.subr.bf16.mxu1 %v5784_v32  ;;  %v5854_v31 = vld [vmem:[%s8806_s1 + $0x134] ss:$8 sps:$4 sm:$0xff]  }
  0x21   :  { %3615 = vmatprep.subr.bf16.mxu0 %v5786_v33  ;;  %v5857_v32 = vld [vmem:[%s8806_s1 + $0x734] ss:$8 sps:$4 sm:$0xff]   ;;  %v5852_v33 = vld [vmem:[%s8806_s1 + $0x130] ss:$8 sps:$4 sm:$0xff]  }
  0x23   :  { %3370 = vmatpush1.bf16.msra.mxu1 %v5788_v34  ;;  %v5855_v34 = vld [vmem:[%s8806_s1 + $0x730] ss:$8 sps:$4 sm:$0xff]  }
  0x24   :  { %3616 = vmatpush1.bf16.msra.mxu0 %v5789_v35  ;;  %3371 = vmatprep.subr.bf16.mxu1 %v5790_v39  ;;  %v5860_v35 = vld [vmem:[%s8806_s1 + $0x144] ss:$8 sps:$4 sm:$0xff]   ;;  %v5866_v39 = vld [vmem:[%s8806_s1 + $0x154] ss:$8 sps:$4 sm:$0xff]  }
  0x25   :  { %3617 = vmatprep.subr.bf16.mxu0 %v5792_v40  ;;  %v5869_v40 = vld [vmem:[%s8806_s1 + $0x754] ss:$8 sps:$4 sm:$0xff]  }
  0x27   :  { %3372 = vmatpush1.bf16.msra.mxu1 %v5794_v41  ;;  %v5864_v41 = vld [vmem:[%s8806_s1 + $0x150] ss:$8 sps:$4 sm:$0xff]  }
  0x28   :  { %3618 = vmatpush1.bf16.msra.mxu0 %v5795_v44  ;;  %3373 = vmatprep.subr.bf16.mxu1 %v5796_v45  ;;  %v5872_v44 = vld [vmem:[%s8806_s1 + $0x164] ss:$8 sps:$4 sm:$0xff]  }
  0x29   :  { %3619 = vmatprep.subr.bf16.mxu0 %v5798_v46  ;;  %v5875_v45 = vld [vmem:[%s8806_s1 + $0x764] ss:$8 sps:$4 sm:$0xff]   ;;  %v5870_v46 = vld [vmem:[%s8806_s1 + $0x160] ss:$8 sps:$4 sm:$0xff]  }
  0x2b   :  { %3374 = vmatpush1.bf16.msra.mxu1 %v5800_v47  ;;  %v5873_v47 = vld [vmem:[%s8806_s1 + $0x760] ss:$8 sps:$4 sm:$0xff]  }
  0x2c   :  { %3620 = vmatpush1.bf16.msra.mxu0 %v5801_v48  ;;  %3375 = vmatprep.subr.bf16.mxu1 %v5802_v50  ;;  %v5878_v48 = vld [vmem:[%s8806_s1 + $0x174] ss:$8 sps:$4 sm:$0xff]  }
  0x2d   :  { %3621 = vmatprep.subr.bf16.mxu0 %v5804_v51  ;;  %v5881_v50 = vld [vmem:[%s8806_s1 + $0x774] ss:$8 sps:$4 sm:$0xff]   ;;  %v5876_v51 = vld [vmem:[%s8806_s1 + $0x170] ss:$8 sps:$4 sm:$0xff]  }
  0x2f   :  { %3376 = vmatpush1.bf16.msra.mxu1 %v5806_v53  ;;  %v5879_v53 = vld [vmem:[%s8806_s1 + $0x770] ss:$8 sps:$4 sm:$0xff]  }
  0x30   :  { %3622 = vmatpush1.bf16.msra.mxu0 %v5807_v55  ;;  %3377 = vmatprep.subr.bf16.mxu1 %v5808_v57  ;;  %v5887_v55 = vld [vmem:[%s8806_s1 + $0x784] ss:$8 sps:$4 sm:$0xff]   ;;  %v5885_v57 = vld [vmem:[%s8806_s1 + $0x780] ss:$8 sps:$4 sm:$0xff]  }
  0x31   :  { %3623 = vmatprep.subr.bf16.mxu0 %v5810_v58  ;;  %v5890_v58 = vld [vmem:[%s8806_s1 + $0x194] ss:$8 sps:$4 sm:$0xff]  }
  0x33   :  { %3378 = vmatpush1.bf16.msra.mxu1 %v5812_v63  ;;  %v5899_v63 = vld [vmem:[%s8806_s1 + $0x7a4] ss:$8 sps:$4 sm:$0xff]  }
  0x34   :  { %3624 = vmatpush1.bf16.msra.mxu0 %v5813_v0  ;;  %3379 = vmatprep.subr.bf16.mxu1 %v5814_v1  ;;  %v5894_v0 = vld [vmem:[%s8806_s1 + $0x1a0] ss:$8 sps:$4 sm:$0xff]  }
  0x35   :  { %3625 = vmatprep.subr.bf16.mxu0 %v5816_v2  ;;  %v5897_v1 = vld [vmem:[%s8806_s1 + $0x7a0] ss:$8 sps:$4 sm:$0xff]   ;;  %v5902_v2 = vld [vmem:[%s8806_s1 + $0x1b4] ss:$8 sps:$4 sm:$0xff]  }
  0x37   :  { %3380 = vmatpush1.bf16.msra.mxu1 %v5818_v5  ;;  %v5903_v5 = vld [vmem:[%s8806_s1 + $0x7b0] ss:$8 sps:$4 sm:$0xff]  }
  0x38   :  { %3626 = vmatpush1.bf16.msra.mxu0 %v5819_v6  ;;  %3381 = vmatprep.subr.bf16.mxu1 %v5820_v7  ;;  %v5908_v6 = vld [vmem:[%s8806_s1 + $0x1c4] ss:$8 sps:$4 sm:$0xff]  }
  0x39   :  { %3627 = vmatprep.subr.bf16.mxu0 %v5822_v8  ;;  %v5911_v7 = vld [vmem:[%s8806_s1 + $0x7c4] ss:$8 sps:$4 sm:$0xff]   ;;  %v5906_v8 = vld [vmem:[%s8806_s1 + $0x1c0] ss:$8 sps:$4 sm:$0xff]  }
  0x3b   :  { %3382 = vmatpush1.bf16.msra.mxu1 %v5824_v9  ;;  %v5909_v9 = vld [vmem:[%s8806_s1 + $0x7c0] ss:$8 sps:$4 sm:$0xff]  }
  0x3c   :  { %3628 = vmatpush1.bf16.msra.mxu0 %v5825_v10  ;;  %3383 = vmatprep.subr.bf16.mxu1 %v5826_v11  ;;  %v5914_v10 = vld [vmem:[%s8806_s1 + $0x1d4] ss:$8 sps:$4 sm:$0xff]  }
  0x3d   :  { %3629 = vmatprep.subr.bf16.mxu0 %v5828_v12  ;;  %v5917_v11 = vld [vmem:[%s8806_s1 + $0x7d4] ss:$8 sps:$4 sm:$0xff]   ;;  %v5912_v12 = vld [vmem:[%s8806_s1 + $0x1d0] ss:$8 sps:$4 sm:$0xff]  }
  0x3f   :  { %3384 = vmatpush1.bf16.msra.mxu1 %v5830_v13  ;;  %v5915_v13 = vld [vmem:[%s8806_s1 + $0x7d0] ss:$8 sps:$4 sm:$0xff]  }
  0x40   :  { %3630 = vmatpush1.bf16.msra.mxu0 %v5831_v14  ;;  %3394 = vmatprep.subr.bf16.mxu1 %v5835_v15  ;;  %v5920_v14 = vld [vmem:[%s8806_s1 + $0x1e4] ss:$8 sps:$4 sm:$0xff]  }
  0x41   :  { %3640 = vmatprep.subr.bf16.mxu0 %v5839_v16  ;;  %v5923_v15 = vld [vmem:[%s8806_s1 + $0x7e4] ss:$8 sps:$4 sm:$0xff]   ;;  %v565_v16 = vcombine.high %v6874_v52, %v6874_v52  ;;  %v5929_v52 = vld [vmem:[%s8806_s1 + $0x7f4] ss:$8 sps:$4 sm:$0xff]  }
  0x42   :  { %3386 = vmatmul.mubr.bf16.vlgmr.msra.gmra.mrb[0].mxu1 %v6945_v17 }
  0x43   :  { %3632 = vmatmul.mubr.bf16.vlgmr.msra.gmra.mrb[0].mxu0 %v6948_v18  ;;  %3395 = vmatpush1.bf16.msra.mxu1 %v5833_v19  ;;  %v5918_v19 = vld [vmem:[%s8806_s1 + $0x1e0] ss:$8 sps:$4 sm:$0xff]  }
  0x44   :  { %3641 = vmatpush1.bf16.msra.mxu0 %v5837_v20  ;;  %3396 = vmatprep.subr.bf16.mxu1 %v5842_v21  ;;  %v5921_v20 = vld [vmem:[%s8806_s1 + $0x7e0] ss:$8 sps:$4 sm:$0xff]   ;;  %v5926_v21 = vld [vmem:[%s8806_s1 + $0x1f4] ss:$8 sps:$4 sm:$0xff]  }
  0x45   :  { %3642 = vmatprep.subr.bf16.mxu0 %v5845_v22  ;;  %3426 = vmatprep.mubr.bf16.mxu1 %v612_v23  ;;  %v7135_v22 = vrot.slane %v565_v16, %v6863_v49  ;;  %v5924_v23 = vld [vmem:[%s8806_s1 + $0x1f0] ss:$8 sps:$4 sm:$0xff]  }
  0x46   :  { %3672 = vmatprep.mubr.bf16.mxu0 %v662_v24  ;;  %v5927_v24 = vld [vmem:[%s8806_s1 + $0x7f0] ss:$8 sps:$4 sm:$0xff]  }
  0x47   :  { %3397 = vmatpush1.bf16.msra.mxu1 %v5840_v25  ;;  %v5932_v25 = vld [vmem:[%s8806_s1 + $0x204] ss:$8 sps:$4 sm:$0xff]   ;;  %v5996_v16 = vld [vmem:[%s8806_s1 + $0x2b0] ss:$8 sps:$4 sm:$0xff]  }
  0x48   :  { %3643 = vmatpush1.bf16.msra.mxu0 %v5843_v26  ;;  %3398 = vmatprep.subr.bf16.mxu1 %v5848_v27  ;;  %v5935_v26 = vld [vmem:[%s8806_s1 + $0x804] ss:$8 sps:$4 sm:$0xff]   ;;  %v581_v27 = vcombine.high %v7135_v22, %v7135_v22 }
  0x49   :  { %3644 = vmatprep.subr.bf16.mxu0 %v5851_v28  ;;  %v610_v28 = vcombine.high %v6945_v17, %v6945_v17  ;;  %v5941_v17 = vld [vmem:[%s8806_s1 + $0x814] ss:$8 sps:$4 sm:$0xff]  }
  0x4b   :  { %3399 = vmatpush1.bf16.msra.mxu1 %v5846_v29  ;;  %v660_v29 = vcombine.high %v6948_v18, %v6948_v18  ;;  %v7168_v18 = vrot.slane %v581_v27, %v6863_v49  ;;  %v6011_v27 = vld [vmem:[%s8806_s1 + $0x8d0] ss:$8 sps:$4 sm:$0xff]  }
  0x4c   :  { %3645 = vmatpush1.bf16.msra.mxu0 %v5849_v30  ;;  %3400 = vmatprep.subr.bf16.mxu1 %v5854_v31  ;;  %v5930_v30 = vld [vmem:[%s8806_s1 + $0x200] ss:$8 sps:$4 sm:$0xff]  }
  0x4d   :  { %3646 = vmatprep.subr.bf16.mxu0 %v5857_v32  ;;  %v5933_v31 = vld [vmem:[%s8806_s1 + $0x800] ss:$8 sps:$4 sm:$0xff]   ;;  %v5938_v32 = vld [vmem:[%s8806_s1 + $0x214] ss:$8 sps:$4 sm:$0xff]  }
  0x4f   :  { %3401 = vmatpush1.bf16.msra.mxu1 %v5852_v33  ;;  %v7173_v33 = vld [vmem:[%s8807_s0 + $0x10] sm:$0xff] }
  0x50   :  { %3647 = vmatpush1.bf16.msra.mxu0 %v5855_v34  ;;  %3402 = vmatprep.subr.bf16.mxu1 %v5860_v35  ;;  %v5936_v34 = vld [vmem:[%s8806_s1 + $0x210] ss:$8 sps:$4 sm:$0xff]   ;;  %v7180_v35 = vrot.slane %v7173_v33, %v6863_v49 }
  0x51   :  { %3648 = vmatprep.subr.bf16.mxu0 %v5863_v36  ;;  %v5939_v36 = vld [vmem:[%s8806_s1 + $0x810] ss:$8 sps:$4 sm:$0xff]  }
  0x53   :  { %3403 = vmatpush1.bf16.msra.mxu1 %v5858_v37  ;;  %v5944_v37 = vld [vmem:[%s8806_s1 + $0x224] ss:$8 sps:$4 sm:$0xff]  }
  0x54   :  { %3649 = vmatpush1.bf16.msra.mxu0 %v5861_v38  ;;  %3404 = vmatprep.subr.bf16.mxu1 %v5866_v39  ;;  %v5947_v38 = vld [vmem:[%s8806_s1 + $0x824] ss:$8 sps:$4 sm:$0xff]   ;;  %v678_v39 = vcombine.high %v7180_v35, %v7180_v35 }
  0x55   :  { %3650 = vmatprep.subr.bf16.mxu0 %v5869_v40  ;;  %v5942_v40 = vld [vmem:[%s8806_s1 + $0x220] ss:$8 sps:$4 sm:$0xff]  }
  0x57   :  { %3405 = vmatpush1.bf16.msra.mxu1 %v5864_v41  ;;  %v7198_v41 = vrot.slane %v678_v39, %v6863_v49  ;;  %v6026_v39 = vld [vmem:[%s8806_s1 + $0x300] ss:$8 sps:$4 sm:$0xff]  }
  0x58   :  { %3651 = vmatpush1.bf16.msra.mxu0 %v5867_v43  ;;  %3406 = vmatprep.subr.bf16.mxu1 %v5872_v44  ;;  %v5945_v43 = vld [vmem:[%s8806_s1 + $0x820] ss:$8 sps:$4 sm:$0xff]   ;;  %v5950_v44 = vld [vmem:[%s8806_s1 + $0x234] ss:$8 sps:$4 sm:$0xff]  }
  0x59   :  { %3652 = vmatprep.subr.bf16.mxu0 %v5875_v45  ;;  %v5953_v45 = vld [vmem:[%s8806_s1 + $0x834] ss:$8 sps:$4 sm:$0xff]  }
  0x5b   :  { %3407 = vmatpush1.bf16.msra.mxu1 %v5870_v46  ;;  %v5948_v46 = vld [vmem:[%s8806_s1 + $0x230] ss:$8 sps:$4 sm:$0xff]  }
  0x5c   :  { %3653 = vmatpush1.bf16.msra.mxu0 %v5873_v47  ;;  %3408 = vmatprep.subr.bf16.mxu1 %v5878_v48  ;;  %v5951_v47 = vld [vmem:[%s8806_s1 + $0x830] ss:$8 sps:$4 sm:$0xff]   ;;  %v5956_v48 = vld [vmem:[%s8806_s1 + $0x244] ss:$8 sps:$4 sm:$0xff]  }
  0x5d   :  { %3654 = vmatprep.subr.bf16.mxu0 %v5881_v50  ;;  %v5959_v50 = vld [vmem:[%s8806_s1 + $0x844] ss:$8 sps:$4 sm:$0xff]  }
  0x5f   :  { %3409 = vmatpush1.bf16.msra.mxu1 %v5876_v51  ;;  %v5954_v51 = vld [vmem:[%s8806_s1 + $0x240] ss:$8 sps:$4 sm:$0xff]  }
  0x60   :  { %3655 = vmatpush1.bf16.msra.mxu0 %v5879_v53  ;;  %3410 = vmatprep.subr.bf16.mxu1 %v5884_v54  ;;  %v5957_v53 = vld [vmem:[%s8806_s1 + $0x840] ss:$8 sps:$4 sm:$0xff]   ;;  %v5962_v54 = vld [vmem:[%s8806_s1 + $0x254] ss:$8 sps:$4 sm:$0xff]  }
  0x61   :  { %3656 = vmatprep.subr.bf16.mxu0 %v5887_v55  ;;  %v5965_v55 = vld [vmem:[%s8806_s1 + $0x854] ss:$8 sps:$4 sm:$0xff]  }
  0x63   :  { %3411 = vmatpush1.bf16.msra.mxu1 %v5882_v56  ;;  %v5960_v56 = vld [vmem:[%s8806_s1 + $0x250] ss:$8 sps:$4 sm:$0xff]  }
  0x64   :  { %3657 = vmatpush1.bf16.msra.mxu0 %v5885_v57  ;;  %3412 = vmatprep.subr.bf16.mxu1 %v5890_v58  ;;  %v5963_v57 = vld [vmem:[%s8806_s1 + $0x850] ss:$8 sps:$4 sm:$0xff]   ;;  %v5968_v58 = vld [vmem:[%s8806_s1 + $0x264] ss:$8 sps:$4 sm:$0xff]  }
  0x65   :  { %3658 = vmatprep.subr.bf16.mxu0 %v5893_v59  ;;  %v5971_v59 = vld [vmem:[%s8806_s1 + $0x864] ss:$8 sps:$4 sm:$0xff]  }
  0x67   :  { %3413 = vmatpush1.bf16.msra.mxu1 %v5888_v60  ;;  %v5966_v60 = vld [vmem:[%s8806_s1 + $0x260] ss:$8 sps:$4 sm:$0xff]  }
  0x68   :  { %3659 = vmatpush1.bf16.msra.mxu0 %v5891_v61  ;;  %3414 = vmatprep.subr.bf16.mxu1 %v5896_v62  ;;  %v5969_v61 = vld [vmem:[%s8806_s1 + $0x860] ss:$8 sps:$4 sm:$0xff]   ;;  %v5974_v62 = vld [vmem:[%s8806_s1 + $0x274] ss:$8 sps:$4 sm:$0xff]  }
  0x69   :  { %3660 = vmatprep.subr.bf16.mxu0 %v5899_v63  ;;  %v5977_v63 = vld [vmem:[%s8806_s1 + $0x874] ss:$8 sps:$4 sm:$0xff]  }
  0x6b   :  { %3415 = vmatpush1.bf16.msra.mxu1 %v5894_v0  ;;  %v5972_v0 = vld [vmem:[%s8806_s1 + $0x270] ss:$8 sps:$4 sm:$0xff]  }
  0x6c   :  { %3661 = vmatpush1.bf16.msra.mxu0 %v5897_v1  ;;  %3416 = vmatprep.subr.bf16.mxu1 %v5902_v2  ;;  %v5975_v1 = vld [vmem:[%s8806_s1 + $0x870] ss:$8 sps:$4 sm:$0xff]   ;;  %v5980_v2 = vld [vmem:[%s8806_s1 + $0x284] ss:$8 sps:$4 sm:$0xff]  }
  0x6d   :  { %3662 = vmatprep.subr.bf16.mxu0 %v5905_v3  ;;  %v5983_v3 = vld [vmem:[%s8806_s1 + $0x884] ss:$8 sps:$4 sm:$0xff]  }
  0x6f   :  { %3417 = vmatpush1.bf16.msra.mxu1 %v5900_v4  ;;  %v5978_v4 = vld [vmem:[%s8806_s1 + $0x280] ss:$8 sps:$4 sm:$0xff]  }
  0x70   :  { %3663 = vmatpush1.bf16.msra.mxu0 %v5903_v5  ;;  %3418 = vmatprep.subr.bf16.mxu1 %v5908_v6  ;;  %v5981_v5 = vld [vmem:[%s8806_s1 + $0x880] ss:$8 sps:$4 sm:$0xff]   ;;  %v5986_v6 = vld [vmem:[%s8806_s1 + $0x294] ss:$8 sps:$4 sm:$0xff]  }
  0x71   :  { %3664 = vmatprep.subr.bf16.mxu0 %v5911_v7  ;;  %v5989_v7 = vld [vmem:[%s8806_s1 + $0x894] ss:$8 sps:$4 sm:$0xff]  }
  0x73   :  { %3419 = vmatpush1.bf16.msra.mxu1 %v5906_v8  ;;  %v5984_v8 = vld [vmem:[%s8806_s1 + $0x290] ss:$8 sps:$4 sm:$0xff]  }
  0x74   :  { %3665 = vmatpush1.bf16.msra.mxu0 %v5909_v9  ;;  %3420 = vmatprep.subr.bf16.mxu1 %v5914_v10  ;;  %v5987_v9 = vld [vmem:[%s8806_s1 + $0x890] ss:$8 sps:$4 sm:$0xff]   ;;  %v5992_v10 = vld [vmem:[%s8806_s1 + $0x2a4] ss:$8 sps:$4 sm:$0xff]  }
  0x75   :  { %3666 = vmatprep.subr.bf16.mxu0 %v5917_v11  ;;  %v5995_v11 = vld [vmem:[%s8806_s1 + $0x8a4] ss:$8 sps:$4 sm:$0xff]  }
  0x77   :  { %3421 = vmatpush1.bf16.msra.mxu1 %v5912_v12  ;;  %v5990_v12 = vld [vmem:[%s8806_s1 + $0x2a0] ss:$8 sps:$4 sm:$0xff]  }
  0x78   :  { %3667 = vmatpush1.bf16.msra.mxu0 %v5915_v13  ;;  %3422 = vmatprep.subr.bf16.mxu1 %v5920_v14  ;;  %v5993_v13 = vld [vmem:[%s8806_s1 + $0x8a0] ss:$8 sps:$4 sm:$0xff]   ;;  %v5998_v14 = vld [vmem:[%s8806_s1 + $0x2b4] ss:$8 sps:$4 sm:$0xff]  }
  0x79   :  { %3668 = vmatprep.subr.bf16.mxu0 %v5923_v15  ;;  %v6001_v15 = vld [vmem:[%s8806_s1 + $0x8b4] ss:$8 sps:$4 sm:$0xff]  }
  0x7b   :  { %3423 = vmatpush1.bf16.msra.mxu1 %v5918_v19  ;;  %v5999_v19 = vld [vmem:[%s8806_s1 + $0x8b0] ss:$8 sps:$4 sm:$0xff]  }
  0x7c   :  { %3669 = vmatpush1.bf16.msra.mxu0 %v5921_v20  ;;  %3424 = vmatprep.subr.bf16.mxu1 %v5926_v21  ;;  %v6004_v20 = vld [vmem:[%s8806_s1 + $0x2c4] ss:$8 sps:$4 sm:$0xff]  }
  0x7d   :  { %3670 = vmatprep.subr.bf16.mxu0 %v5929_v52  ;;  %v6007_v21 = vld [vmem:[%s8806_s1 + $0x8c4] ss:$8 sps:$4 sm:$0xff]   ;;  %v6002_v52 = vld [vmem:[%s8806_s1 + $0x2c0] ss:$8 sps:$4 sm:$0xff]  }
  0x7f   :  { %3425 = vmatpush1.bf16.msra.mxu1 %v5924_v23  ;;  %v6005_v23 = vld [vmem:[%s8806_s1 + $0x8c0] ss:$8 sps:$4 sm:$0xff]  }
  0x80   :  { %3671 = vmatpush1.bf16.msra.mxu0 %v5927_v24  ;;  %3435 = vmatprep.subr.bf16.mxu1 %v5932_v25  ;;  %v6010_v24 = vld [vmem:[%s8806_s1 + $0x2d4] ss:$8 sps:$4 sm:$0xff]  }
  0x81   :  { %3681 = vmatprep.subr.bf16.mxu0 %v5935_v26  ;;  %v6013_v25 = vld [vmem:[%s8806_s1 + $0x8d4] ss:$8 sps:$4 sm:$0xff]   ;;  %v6008_v26 = vld [vmem:[%s8806_s1 + $0x2d0] ss:$8 sps:$4 sm:$0xff]  }
  0x82   :  { %3427 = vmatmul.mubr.bf16.vlgmr.msra.gmra.mrb[0].mxu1 %v610_v28  ;;  %v6016_v28 = vld [vmem:[%s8806_s1 + $0x2e4] ss:$8 sps:$4 sm:$0xff]  }
  0x83   :  { %3673 = vmatmul.mubr.bf16.vlgmr.msra.gmra.mrb[0].mxu0 %v660_v29  ;;  %3436 = vmatpush1.bf16.msra.mxu1 %v5930_v30  ;;  %v6019_v29 = vld [vmem:[%s8806_s1 + $0x8e4] ss:$8 sps:$4 sm:$0xff]   ;;  %v6014_v30 = vld [vmem:[%s8806_s1 + $0x2e0] ss:$8 sps:$4 sm:$0xff]  }
  0x84   :  { %3682 = vmatpush1.bf16.msra.mxu0 %v5933_v31  ;;  %3437 = vmatprep.subr.bf16.mxu1 %v5938_v32  ;;  %v6017_v31 = vld [vmem:[%s8806_s1 + $0x8e0] ss:$8 sps:$4 sm:$0xff]   ;;  %v6022_v32 = vld [vmem:[%s8806_s1 + $0x2f4] ss:$8 sps:$4 sm:$0xff]  }
  0x85   :  { %3683 = vmatprep.subr.bf16.mxu0 %v5941_v17  ;;  %3467 = vmatprep.mubr.bf16.mxu1 %v7168_v18  ;;  %v6025_v17 = vld [vmem:[%s8806_s1 + $0x8f4] ss:$8 sps:$4 sm:$0xff]  }
  0x86   :  { %3713 = vmatprep.mubr.bf16.mxu0 %v7198_v41 }
  0x87   :  { %3438 = vmatpush1.bf16.msra.mxu1 %v5936_v34  ;;  %v6020_v34 = vld [vmem:[%s8806_s1 + $0x2f0] ss:$8 sps:$4 sm:$0xff]  }
  0x88   :  { %3684 = vmatpush1.bf16.msra.mxu0 %v5939_v36  ;;  %3439 = vmatprep.subr.bf16.mxu1 %v5944_v37  ;;  %v6023_v36 = vld [vmem:[%s8806_s1 + $0x8f0] ss:$8 sps:$4 sm:$0xff]   ;;  %v6028_v37 = vld [vmem:[%s8806_s1 + $0x304] ss:$8 sps:$4 sm:$0xff]  }
  0x89   :  { %3685 = vmatprep.subr.bf16.mxu0 %v5947_v38  ;;  %v6031_v38 = vld [vmem:[%s8806_s1 + $0x904] ss:$8 sps:$4 sm:$0xff]  }
  0x8b   :  { %3440 = vmatpush1.bf16.msra.mxu1 %v5942_v40  ;;  %v7371_v40 = vrot.slane %v7135_v22, %v6863_v49  ;;  %v6037_v22 = vld [vmem:[%s8806_s1 + $0x914] ss:$8 sps:$4 sm:$0xff]  }
  0x8c   :  { %3686 = vmatpush1.bf16.msra.mxu0 %v5945_v43  ;;  %3441 = vmatprep.subr.bf16.mxu1 %v5950_v44  ;;  %v7375_v43 = vrot.slane %v7180_v35, %v6863_v49  ;;  %v6029_v44 = vld [vmem:[%s8806_s1 + $0x900] ss:$8 sps:$4 sm:$0xff]   ;;  %v613_v35 = vcombine.high %v7168_v18, %v7168_v18  ;;  %v6040_v18 = vld [vmem:[%s8806_s1 + $0x324] ss:$8 sps:$4 sm:$0xff]  }
  0x8d   :  { %3687 = vmatprep.subr.bf16.mxu0 %v5953_v45  ;;  %v6034_v45 = vld [vmem:[%s8806_s1 + $0x314] ss:$8 sps:$4 sm:$0xff]  }
  0x8f   :  { %3442 = vmatpush1.bf16.msra.mxu1 %v5948_v46  ;;  %v710_v46 = vcombine.high %v7198_v41, %v7198_v41  ;;  %v6043_v41 = vld [vmem:[%s8806_s1 + $0x924] ss:$8 sps:$4 sm:$0xff]  }
  0x90   :  { %3688 = vmatpush1.bf16.msra.mxu0 %v5951_v47  ;;  %3443 = vmatprep.subr.bf16.mxu1 %v5956_v48  ;;  %v6032_v47 = vld [vmem:[%s8806_s1 + $0x310] ss:$8 sps:$4 sm:$0xff]  }
  0x91   :  { %3689 = vmatprep.subr.bf16.mxu0 %v5959_v50  ;;  %v6035_v48 = vld [vmem:[%s8806_s1 + $0x910] ss:$8 sps:$4 sm:$0xff]   ;;  %v6038_v50 = vld [vmem:[%s8806_s1 + $0x320] ss:$8 sps:$4 sm:$0xff]  }
  0x93   :  { %3444 = vmatpush1.bf16.msra.mxu1 %v5954_v51  ;;  %v6041_v51 = vld [vmem:[%s8806_s1 + $0x920] ss:$8 sps:$4 sm:$0xff]  }
  0x94   :  { %3690 = vmatpush1.bf16.msra.mxu0 %v5957_v53  ;;  %3445 = vmatprep.subr.bf16.mxu1 %v5962_v54  ;;  %v6046_v53 = vld [vmem:[%s8806_s1 + $0x334] ss:$8 sps:$4 sm:$0xff]  }
  0x95   :  { %3691 = vmatprep.subr.bf16.mxu0 %v5965_v55  ;;  %v6049_v54 = vld [vmem:[%s8806_s1 + $0x934] ss:$8 sps:$4 sm:$0xff]   ;;  %v6044_v55 = vld [vmem:[%s8806_s1 + $0x330] ss:$8 sps:$4 sm:$0xff]  }
  0x97   :  { %3446 = vmatpush1.bf16.msra.mxu1 %v5960_v56  ;;  %v6047_v56 = vld [vmem:[%s8806_s1 + $0x930] ss:$8 sps:$4 sm:$0xff]  }
  0x98   :  { %3692 = vmatpush1.bf16.msra.mxu0 %v5963_v57  ;;  %3447 = vmatprep.subr.bf16.mxu1 %v5968_v58  ;;  %v6052_v57 = vld [vmem:[%s8806_s1 + $0x344] ss:$8 sps:$4 sm:$0xff]  }
  0x99   :  { %3693 = vmatprep.subr.bf16.mxu0 %v5971_v59  ;;  %v6055_v58 = vld [vmem:[%s8806_s1 + $0x944] ss:$8 sps:$4 sm:$0xff]   ;;  %v6050_v59 = vld [vmem:[%s8806_s1 + $0x340] ss:$8 sps:$4 sm:$0xff]  }
  0x9b   :  { %3448 = vmatpush1.bf16.msra.mxu1 %v5966_v60  ;;  %v6053_v60 = vld [vmem:[%s8806_s1 + $0x940] ss:$8 sps:$4 sm:$0xff]  }
  0x9c   :  { %3694 = vmatpush1.bf16.msra.mxu0 %v5969_v61  ;;  %3449 = vmatprep.subr.bf16.mxu1 %v5974_v62  ;;  %v6058_v61 = vld [vmem:[%s8806_s1 + $0x354] ss:$8 sps:$4 sm:$0xff]  }
  0x9d   :  { %3695 = vmatprep.subr.bf16.mxu0 %v5977_v63  ;;  %v6061_v62 = vld [vmem:[%s8806_s1 + $0x954] ss:$8 sps:$4 sm:$0xff]   ;;  %v6056_v63 = vld [vmem:[%s8806_s1 + $0x350] ss:$8 sps:$4 sm:$0xff]  }
  0x9f   :  { %3450 = vmatpush1.bf16.msra.mxu1 %v5972_v0  ;;  %v6059_v0 = vld [vmem:[%s8806_s1 + $0x950] ss:$8 sps:$4 sm:$0xff]  }
  0xa0   :  { %3696 = vmatpush1.bf16.msra.mxu0 %v5975_v1  ;;  %3451 = vmatprep.subr.bf16.mxu1 %v5980_v2  ;;  %v6064_v1 = vld [vmem:[%s8806_s1 + $0x364] ss:$8 sps:$4 sm:$0xff]  }
  0xa1   :  { %3697 = vmatprep.subr.bf16.mxu0 %v5983_v3  ;;  %v6067_v2 = vld [vmem:[%s8806_s1 + $0x964] ss:$8 sps:$4 sm:$0xff]   ;;  %v6062_v3 = vld [vmem:[%s8806_s1 + $0x360] ss:$8 sps:$4 sm:$0xff]  }
  0xa3   :  { %3452 = vmatpush1.bf16.msra.mxu1 %v5978_v4  ;;  %v6065_v4 = vld [vmem:[%s8806_s1 + $0x960] ss:$8 sps:$4 sm:$0xff]  }
  0xa4   :  { %3698 = vmatpush1.bf16.msra.mxu0 %v5981_v5  ;;  %3453 = vmatprep.subr.bf16.mxu1 %v5986_v6  ;;  %v6070_v5 = vld [vmem:[%s8806_s1 + $0x374] ss:$8 sps:$4 sm:$0xff]  }
  0xa5   :  { %3699 = vmatprep.subr.bf16.mxu0 %v5989_v7  ;;  %v6073_v6 = vld [vmem:[%s8806_s1 + $0x974] ss:$8 sps:$4 sm:$0xff]   ;;  %v6068_v7 = vld [vmem:[%s8806_s1 + $0x370] ss:$8 sps:$4 sm:$0xff]  }
  0xa7   :  { %3454 = vmatpush1.bf16.msra.mxu1 %v5984_v8  ;;  %v6071_v8 = vld [vmem:[%s8806_s1 + $0x970] ss:$8 sps:$4 sm:$0xff]  }
  0xa8   :  { %3700 = vmatpush1.bf16.msra.mxu0 %v5987_v9  ;;  %3455 = vmatprep.subr.bf16.mxu1 %v5992_v10  ;;  %v6076_v9 = vld [vmem:[%s8806_s1 + $0x384] ss:$8 sps:$4 sm:$0xff]  }
  0xa9   :  { %3701 = vmatprep.subr.bf16.mxu0 %v5995_v11  ;;  %v6079_v10 = vld [vmem:[%s8806_s1 + $0x984] ss:$8 sps:$4 sm:$0xff]   ;;  %v6074_v11 = vld [vmem:[%s8806_s1 + $0x380] ss:$8 sps:$4 sm:$0xff]  }
  0xab   :  { %3456 = vmatpush1.bf16.msra.mxu1 %v5990_v12  ;;  %v6077_v12 = vld [vmem:[%s8806_s1 + $0x980] ss:$8 sps:$4 sm:$0xff]  }
  0xac   :  { %3702 = vmatpush1.bf16.msra.mxu0 %v5993_v13  ;;  %3457 = vmatprep.subr.bf16.mxu1 %v5998_v14  ;;  %v6082_v13 = vld [vmem:[%s8806_s1 + $0x394] ss:$8 sps:$4 sm:$0xff]  }
  0xad   :  { %3703 = vmatprep.subr.bf16.mxu0 %v6001_v15  ;;  %v6085_v14 = vld [vmem:[%s8806_s1 + $0x994] ss:$8 sps:$4 sm:$0xff]   ;;  %v6080_v15 = vld [vmem:[%s8806_s1 + $0x390] ss:$8 sps:$4 sm:$0xff]  }
  0xaf   :  { %3458 = vmatpush1.bf16.msra.mxu1 %v5996_v16  ;;  %v6083_v16 = vld [vmem:[%s8806_s1 + $0x990] ss:$8 sps:$4 sm:$0xff]  }
  0xb0   :  { %3704 = vmatpush1.bf16.msra.mxu0 %v5999_v19  ;;  %3459 = vmatprep.subr.bf16.mxu1 %v6004_v20  ;;  %v6088_v19 = vld [vmem:[%s8806_s1 + $0x3a4] ss:$8 sps:$4 sm:$0xff]  }
  0xb1   :  { %3705 = vmatprep.subr.bf16.mxu0 %v6007_v21  ;;  %v6091_v20 = vld [vmem:[%s8806_s1 + $0x9a4] ss:$8 sps:$4 sm:$0xff]   ;;  %v6086_v21 = vld [vmem:[%s8806_s1 + $0x3a0] ss:$8 sps:$4 sm:$0xff]  }
  0xb3   :  { %3460 = vmatpush1.bf16.msra.mxu1 %v6002_v52  ;;  %v6089_v52 = vld [vmem:[%s8806_s1 + $0x9a0] ss:$8 sps:$4 sm:$0xff]  }
  0xb4   :  { %3706 = vmatpush1.bf16.msra.mxu0 %v6005_v23  ;;  %3461 = vmatprep.subr.bf16.mxu1 %v6010_v24  ;;  %v6094_v23 = vld [vmem:[%s8806_s1 + $0x3b4] ss:$8 sps:$4 sm:$0xff]  }
  0xb5   :  { %3707 = vmatprep.subr.bf16.mxu0 %v6013_v25  ;;  %v6097_v24 = vld [vmem:[%s8806_s1 + $0x9b4] ss:$8 sps:$4 sm:$0xff]   ;;  %v6092_v25 = vld [vmem:[%s8806_s1 + $0x3b0] ss:$8 sps:$4 sm:$0xff]  }
  0xb7   :  { %3462 = vmatpush1.bf16.msra.mxu1 %v6008_v26  ;;  %v6095_v26 = vld [vmem:[%s8806_s1 + $0x9b0] ss:$8 sps:$4 sm:$0xff]  }
  0xb8   :  { %3708 = vmatpush1.bf16.msra.mxu0 %v6011_v27  ;;  %3463 = vmatprep.subr.bf16.mxu1 %v6016_v28  ;;  %v6100_v27 = vld [vmem:[%s8806_s1 + $0x3c4] ss:$8 sps:$4 sm:$0xff]  }
  0xb9   :  { %3709 = vmatprep.subr.bf16.mxu0 %v6019_v29  ;;  %v6103_v28 = vld [vmem:[%s8806_s1 + $0x9c4] ss:$8 sps:$4 sm:$0xff]   ;;  %v6098_v29 = vld [vmem:[%s8806_s1 + $0x3c0] ss:$8 sps:$4 sm:$0xff]  }
  0xbb   :  { %3464 = vmatpush1.bf16.msra.mxu1 %v6014_v30  ;;  %v6101_v30 = vld [vmem:[%s8806_s1 + $0x9c0] ss:$8 sps:$4 sm:$0xff]  }
  0xbc   :  { %3710 = vmatpush1.bf16.msra.mxu0 %v6017_v31  ;;  %3465 = vmatprep.subr.bf16.mxu1 %v6022_v32  ;;  %v6106_v31 = vld [vmem:[%s8806_s1 + $0x3d4] ss:$8 sps:$4 sm:$0xff]  }
  0xbd   :  { %3711 = vmatprep.subr.bf16.mxu0 %v6025_v17  ;;  %v6109_v32 = vld [vmem:[%s8806_s1 + $0x9d4] ss:$8 sps:$4 sm:$0xff]   ;;  %v6104_v17 = vld [vmem:[%s8806_s1 + $0x3d0] ss:$8 sps:$4 sm:$0xff]  }
  0xbf   :  { %3466 = vmatpush1.bf16.msra.mxu1 %v6020_v34  ;;  %v6107_v34 = vld [vmem:[%s8806_s1 + $0x9d0] ss:$8 sps:$4 sm:$0xff]  }
  0xc0   :  { %3712 = vmatpush1.bf16.msra.mxu0 %v6023_v36  ;;  %3476 = vmatprep.subr.bf16.mxu1 %v6028_v37  ;;  %v6112_v36 = vld [vmem:[%s8806_s1 + $0x3e4] ss:$8 sps:$4 sm:$0xff]  }
  0xc1   :  { %3722 = vmatprep.subr.bf16.mxu0 %v6031_v38  ;;  %v6115_v37 = vld [vmem:[%s8806_s1 + $0x9e4] ss:$8 sps:$4 sm:$0xff]   ;;  %v663_v38 = vcombine.high %v7173_v33, %v7173_v33  ;;  %v6121_v33 = vld [vmem:[%s8806_s1 + $0x9f4] ss:$8 sps:$4 sm:$0xff]  }
  0xc2   :  { %3468 = vmatmul.mubr.bf16.vlgmr.msra.gmra.mrb[0].mxu1 %v7371_v40 }
  0xc3   :  { %3714 = vmatmul.mubr.bf16.vlgmr.msra.gmra.mrb[0].mxu0 %v7375_v43  ;;  %3477 = vmatpush1.bf16.msra.mxu1 %v6026_v39  ;;  %v6110_v39 = vld [vmem:[%s8806_s1 + $0x3e0] ss:$8 sps:$4 sm:$0xff]  }
  0xc4   :  { %3723 = vmatpush1.bf16.msra.mxu0 %v6029_v44  ;;  %3478 = vmatprep.subr.bf16.mxu1 %v6034_v45  ;;  %v6113_v44 = vld [vmem:[%s8806_s1 + $0x9e0] ss:$8 sps:$4 sm:$0xff]   ;;  %v6118_v45 = vld [vmem:[%s8806_s1 + $0x3f4] ss:$8 sps:$4 sm:$0xff]  }
  0xc5   :  { %3724 = vmatprep.subr.bf16.mxu0 %v6037_v22  ;;  %3508 = vmatprep.mubr.bf16.mxu1 %v613_v35  ;;  %v7565_v22 = vld.sshfl [vmem:[%s8807_s0 + $0x8] sm:$0xff pattern:$0x75316420]  ;;  %v7568_v35 = vrot.slane %v663_v38, %v6863_v49  ;;  %v6191_v38 = vld [vmem:[%s8806_s1 + $0xab0] ss:$8 sps:$4 sm:$0xff]  }
  0xc6   :  { %3754 = vmatprep.mubr.bf16.mxu0 %v710_v46  ;;  %v6116_v46 = vld [vmem:[%s8806_s1 + $0x3f0] ss:$8 sps:$4 sm:$0xff]  }
  0xc7   :  { %3479 = vmatpush1.bf16.msra.mxu1 %v6032_v47  ;;  %v6119_v47 = vld [vmem:[%s8806_s1 + $0x9f0] ss:$8 sps:$4 sm:$0xff]  }
  0xc8   :  { %3725 = vmatpush1.bf16.msra.mxu0 %v6035_v48  ;;  %3480 = vmatprep.subr.bf16.mxu1 %v6040_v18  ;;  %v6124_v48 = vld [vmem:[%s8806_s1 + $0x404] ss:$8 sps:$4 sm:$0xff]  }
  0xc9   :  { %3726 = vmatprep.subr.bf16.mxu0 %v6043_v41  ;;  %v6127_v18 = vld [vmem:[%s8806_s1 + $0xa04] ss:$8 sps:$4 sm:$0xff]   ;;  %v629_v41 = vcombine.high %v7565_v22, %v7565_v22 }
  0xcb   :  { %3481 = vmatpush1.bf16.msra.mxu1 %v6038_v50  ;;  %v679_v50 = vcombine.high %v7568_v35, %v7568_v35 }
  0xcc   :  { %3727 = vmatpush1.bf16.msra.mxu0 %v6041_v51  ;;  %3482 = vmatprep.subr.bf16.mxu1 %v6046_v53  ;;  %v6122_v51 = vld [vmem:[%s8806_s1 + $0x400] ss:$8 sps:$4 sm:$0xff]   ;;  %v611_v53 = vcombine.high %v7371_v40, %v7371_v40  ;;  %v6128_v40 = vld [vmem:[%s8806_s1 + $0x410] ss:$8 sps:$4 sm:$0xff]  }
  0xcd   :  { %3728 = vmatprep.subr.bf16.mxu0 %v6049_v54  ;;  %v708_v54 = vcombine.high %v7375_v43, %v7375_v43  ;;  %v6131_v43 = vld [vmem:[%s8806_s1 + $0xa10] ss:$8 sps:$4 sm:$0xff]  }
  0xcf   :  { %3483 = vmatpush1.bf16.msra.mxu1 %v6044_v55  ;;  %v6125_v55 = vld [vmem:[%s8806_s1 + $0xa00] ss:$8 sps:$4 sm:$0xff]  }
  0xd0   :  { %3729 = vmatpush1.bf16.msra.mxu0 %v6047_v56  ;;  %3484 = vmatprep.subr.bf16.mxu1 %v6052_v57  ;;  %v6130_v56 = vld [vmem:[%s8806_s1 + $0x414] ss:$8 sps:$4 sm:$0xff]  }
  0xd1   :  { %3730 = vmatprep.subr.bf16.mxu0 %v6055_v58  ;;  %v6133_v57 = vld [vmem:[%s8806_s1 + $0xa14] ss:$8 sps:$4 sm:$0xff]   ;;  %v7609_v58 = vrot.slane %v629_v41, %v6863_v49  ;;  %v6208_v41 = vld [vmem:[%s8806_s1 + $0x4e4] ss:$8 sps:$4 sm:$0xff]  }
  0xd3   :  { %3485 = vmatpush1.bf16.msra.mxu1 %v6050_v59  ;;  %v7612_v59 = vrot.slane %v679_v50, %v6863_v49  ;;  %v6211_v50 = vld [vmem:[%s8806_s1 + $0xae4] ss:$8 sps:$4 sm:$0xff]  }
  0xd4   :  { %3731 = vmatpush1.bf16.msra.mxu0 %v6053_v60  ;;  %3486 = vmatprep.subr.bf16.mxu1 %v6058_v61  ;;  %v6136_v60 = vld [vmem:[%s8806_s1 + $0x424] ss:$8 sps:$4 sm:$0xff]  }
  0xd5   :  { %3732 = vmatprep.subr.bf16.mxu0 %v6061_v62  ;;  %v6139_v61 = vld [vmem:[%s8806_s1 + $0xa24] ss:$8 sps:$4 sm:$0xff]   ;;  %v6134_v62 = vld [vmem:[%s8806_s1 + $0x420] ss:$8 sps:$4 sm:$0xff]  }
  0xd7   :  { %3487 = vmatpush1.bf16.msra.mxu1 %v6056_v63  ;;  %v6137_v63 = vld [vmem:[%s8806_s1 + $0xa20] ss:$8 sps:$4 sm:$0xff]  }
  0xd8   :  { %3733 = vmatpush1.bf16.msra.mxu0 %v6059_v0  ;;  %3488 = vmatprep.subr.bf16.mxu1 %v6064_v1  ;;  %v6142_v0 = vld [vmem:[%s8806_s1 + $0x434] ss:$8 sps:$4 sm:$0xff]  }
  0xd9   :  { %3734 = vmatprep.subr.bf16.mxu0 %v6067_v2  ;;  %v6145_v1 = vld [vmem:[%s8806_s1 + $0xa34] ss:$8 sps:$4 sm:$0xff]   ;;  %v6140_v2 = vld [vmem:[%s8806_s1 + $0x430] ss:$8 sps:$4 sm:$0xff]  }
  0xdb   :  { %3489 = vmatpush1.bf16.msra.mxu1 %v6062_v3  ;;  %v6143_v3 = vld [vmem:[%s8806_s1 + $0xa30] ss:$8 sps:$4 sm:$0xff]  }
  0xdc   :  { %3735 = vmatpush1.bf16.msra.mxu0 %v6065_v4  ;;  %3490 = vmatprep.subr.bf16.mxu1 %v6070_v5  ;;  %v6148_v4 = vld [vmem:[%s8806_s1 + $0x444] ss:$8 sps:$4 sm:$0xff]  }
  0xdd   :  { %3736 = vmatprep.subr.bf16.mxu0 %v6073_v6  ;;  %v6151_v5 = vld [vmem:[%s8806_s1 + $0xa44] ss:$8 sps:$4 sm:$0xff]   ;;  %v6146_v6 = vld [vmem:[%s8806_s1 + $0x440] ss:$8 sps:$4 sm:$0xff]  }
  0xdf   :  { %3491 = vmatpush1.bf16.msra.mxu1 %v6068_v7  ;;  %v6149_v7 = vld [vmem:[%s8806_s1 + $0xa40] ss:$8 sps:$4 sm:$0xff]  }
  0xe0   :  { %3737 = vmatpush1.bf16.msra.mxu0 %v6071_v8  ;;  %3492 = vmatprep.subr.bf16.mxu1 %v6076_v9  ;;  %v6154_v8 = vld [vmem:[%s8806_s1 + $0x454] ss:$8 sps:$4 sm:$0xff]  }
  0xe1   :  { %3738 = vmatprep.subr.bf16.mxu0 %v6079_v10  ;;  %v6157_v9 = vld [vmem:[%s8806_s1 + $0xa54] ss:$8 sps:$4 sm:$0xff]   ;;  %v6152_v10 = vld [vmem:[%s8806_s1 + $0x450] ss:$8 sps:$4 sm:$0xff]  }
  0xe3   :  { %3493 = vmatpush1.bf16.msra.mxu1 %v6074_v11  ;;  %v6155_v11 = vld [vmem:[%s8806_s1 + $0xa50] ss:$8 sps:$4 sm:$0xff]  }
  0xe4   :  { %3739 = vmatpush1.bf16.msra.mxu0 %v6077_v12  ;;  %3494 = vmatprep.subr.bf16.mxu1 %v6082_v13  ;;  %v6160_v12 = vld [vmem:[%s8806_s1 + $0x464] ss:$8 sps:$4 sm:$0xff]  }
  0xe5   :  { %3740 = vmatprep.subr.bf16.mxu0 %v6085_v14  ;;  %v6163_v13 = vld [vmem:[%s8806_s1 + $0xa64] ss:$8 sps:$4 sm:$0xff]   ;;  %v6158_v14 = vld [vmem:[%s8806_s1 + $0x460] ss:$8 sps:$4 sm:$0xff]  }
  0xe7   :  { %3495 = vmatpush1.bf16.msra.mxu1 %v6080_v15  ;;  %v6161_v15 = vld [vmem:[%s8806_s1 + $0xa60] ss:$8 sps:$4 sm:$0xff]  }
  0xe8   :  { %3741 = vmatpush1.bf16.msra.mxu0 %v6083_v16  ;;  %3496 = vmatprep.subr.bf16.mxu1 %v6088_v19  ;;  %v6166_v16 = vld [vmem:[%s8806_s1 + $0x474] ss:$8 sps:$4 sm:$0xff]  }
  0xe9   :  { %3742 = vmatprep.subr.bf16.mxu0 %v6091_v20  ;;  %v6169_v19 = vld [vmem:[%s8806_s1 + $0xa74] ss:$8 sps:$4 sm:$0xff]   ;;  %v6164_v20 = vld [vmem:[%s8806_s1 + $0x470] ss:$8 sps:$4 sm:$0xff]  }
  0xeb   :  { %3497 = vmatpush1.bf16.msra.mxu1 %v6086_v21  ;;  %v6167_v21 = vld [vmem:[%s8806_s1 + $0xa70] ss:$8 sps:$4 sm:$0xff]  }
  0xec   :  { %3743 = vmatpush1.bf16.msra.mxu0 %v6089_v52  ;;  %3498 = vmatprep.subr.bf16.mxu1 %v6094_v23  ;;  %v6172_v52 = vld [vmem:[%s8806_s1 + $0x484] ss:$8 sps:$4 sm:$0xff]  }
  0xed   :  { %3744 = vmatprep.subr.bf16.mxu0 %v6097_v24  ;;  %v6175_v23 = vld [vmem:[%s8806_s1 + $0xa84] ss:$8 sps:$4 sm:$0xff]   ;;  %v6170_v24 = vld [vmem:[%s8806_s1 + $0x480] ss:$8 sps:$4 sm:$0xff]  }
  0xef   :  { %3499 = vmatpush1.bf16.msra.mxu1 %v6092_v25  ;;  %v6173_v25 = vld [vmem:[%s8806_s1 + $0xa80] ss:$8 sps:$4 sm:$0xff]  }
  0xf0   :  { %3745 = vmatpush1.bf16.msra.mxu0 %v6095_v26  ;;  %3500 = vmatprep.subr.bf16.mxu1 %v6100_v27  ;;  %v6178_v26 = vld [vmem:[%s8806_s1 + $0x494] ss:$8 sps:$4 sm:$0xff]  }
  0xf1   :  { %3746 = vmatprep.subr.bf16.mxu0 %v6103_v28  ;;  %v6181_v27 = vld [vmem:[%s8806_s1 + $0xa94] ss:$8 sps:$4 sm:$0xff]   ;;  %v6176_v28 = vld [vmem:[%s8806_s1 + $0x490] ss:$8 sps:$4 sm:$0xff]  }
  0xf3   :  { %3501 = vmatpush1.bf16.msra.mxu1 %v6098_v29  ;;  %v6179_v29 = vld [vmem:[%s8806_s1 + $0xa90] ss:$8 sps:$4 sm:$0xff]  }
  0xf4   :  { %3747 = vmatpush1.bf16.msra.mxu0 %v6101_v30  ;;  %3502 = vmatprep.subr.bf16.mxu1 %v6106_v31  ;;  %v6184_v30 = vld [vmem:[%s8806_s1 + $0x4a4] ss:$8 sps:$4 sm:$0xff]  }
  0xf5   :  { %3748 = vmatprep.subr.bf16.mxu0 %v6109_v32  ;;  %v6187_v31 = vld [vmem:[%s8806_s1 + $0xaa4] ss:$8 sps:$4 sm:$0xff]   ;;  %v6182_v32 = vld [vmem:[%s8806_s1 + $0x4a0] ss:$8 sps:$4 sm:$0xff]  }
  0xf7   :  { %3503 = vmatpush1.bf16.msra.mxu1 %v6104_v17  ;;  %v6185_v17 = vld [vmem:[%s8806_s1 + $0xaa0] ss:$8 sps:$4 sm:$0xff]  }
  0xf8   :  { %3749 = vmatpush1.bf16.msra.mxu0 %v6107_v34  ;;  %3504 = vmatprep.subr.bf16.mxu1 %v6112_v36  ;;  %v6190_v34 = vld [vmem:[%s8806_s1 + $0x4b4] ss:$8 sps:$4 sm:$0xff]  }
  0xf9   :  { %3750 = vmatprep.subr.bf16.mxu0 %v6115_v37  ;;  %v6193_v36 = vld [vmem:[%s8806_s1 + $0xab4] ss:$8 sps:$4 sm:$0xff]   ;;  %v6188_v37 = vld [vmem:[%s8806_s1 + $0x4b0] ss:$8 sps:$4 sm:$0xff]  }
  0xfb   :  { %3505 = vmatpush1.bf16.msra.mxu1 %v6110_v39  ;;  %v6196_v39 = vld [vmem:[%s8806_s1 + $0x4c4] ss:$8 sps:$4 sm:$0xff]  }
  0xfc   :  { %3751 = vmatpush1.bf16.msra.mxu0 %v6113_v44  ;;  %3506 = vmatprep.subr.bf16.mxu1 %v6118_v45  ;;  %v6199_v44 = vld [vmem:[%s8806_s1 + $0xac4] ss:$8 sps:$4 sm:$0xff]   ;;  %v6194_v45 = vld [vmem:[%s8806_s1 + $0x4c0] ss:$8 sps:$4 sm:$0xff]  }
  0xfd   :  { %3752 = vmatprep.subr.bf16.mxu0 %v6121_v33  ;;  %v6197_v33 = vld [vmem:[%s8806_s1 + $0xac0] ss:$8 sps:$4 sm:$0xff]  }
  0xff   :  { %3507 = vmatpush1.bf16.msra.mxu1 %v6116_v46  ;;  %v6202_v46 = vld [vmem:[%s8806_s1 + $0x4d4] ss:$8 sps:$4 sm:$0xff]  }
 0x100   :  { %3753 = vmatpush1.bf16.msra.mxu0 %v6119_v47  ;;  %3517 = vmatprep.subr.bf16.mxu1 %v6124_v48  ;;  %v6205_v47 = vld [vmem:[%s8806_s1 + $0xad4] ss:$8 sps:$4 sm:$0xff]   ;;  %v6200_v48 = vld [vmem:[%s8806_s1 + $0x4d0] ss:$8 sps:$4 sm:$0xff]  }
 0x101   :  { %3763 = vmatprep.subr.bf16.mxu0 %v6127_v18  ;;  %v6203_v18 = vld [vmem:[%s8806_s1 + $0xad0] ss:$8 sps:$4 sm:$0xff]  }
 0x102   :  { %3509 = vmatmul.mubr.bf16.vlgmr.msra.gmra.mrb[0].mxu1 %v611_v53  ;;  %v6209_v53 = vld [vmem:[%s8806_s1 + $0xae0] ss:$8 sps:$4 sm:$0xff]  }
 0x103   :  { %3755 = vmatmul.mubr.bf16.vlgmr.msra.gmra.mrb[0].mxu0 %v708_v54  ;;  %3518 = vmatpush1.bf16.msra.mxu1 %v6122_v51  ;;  %v6206_v51 = vld [vmem:[%s8806_s1 + $0x4e0] ss:$8 sps:$4 sm:$0xff]   ;;  %v6214_v54 = vld [vmem:[%s8806_s1 + $0x4f4] ss:$8 sps:$4 sm:$0xff]  }
 0x104   :  { %3764 = vmatpush1.bf16.msra.mxu0 %v6125_v55  ;;  %3519 = vmatprep.subr.bf16.mxu1 %v6130_v56  ;;  %v6217_v55 = vld [vmem:[%s8806_s1 + $0xaf4] ss:$8 sps:$4 sm:$0xff]   ;;  %v6212_v56 = vld [vmem:[%s8806_s1 + $0x4f0] ss:$8 sps:$4 sm:$0xff]  }
 0x105   :  { %3765 = vmatprep.subr.bf16.mxu0 %v6133_v57  ;;  %3549 = vmatprep.mubr.bf16.mxu1 %v7609_v58  ;;  %v6215_v57 = vld [vmem:[%s8806_s1 + $0xaf0] ss:$8 sps:$4 sm:$0xff]  }
 0x106   :  { %3795 = vmatprep.mubr.bf16.mxu0 %v7612_v59 }
 0x107   :  { %3520 = vmatpush1.bf16.msra.mxu1 %v6128_v40  ;;  %v6220_v40 = vld [vmem:[%s8806_s1 + $0x504] ss:$8 sps:$4 sm:$0xff]  }
 0x108   :  { %3766 = vmatpush1.bf16.msra.mxu0 %v6131_v43  ;;  %3521 = vmatprep.subr.bf16.mxu1 %v6136_v60  ;;  %v6224_v43 = vld [vmem:[%s8806_s1 + $0xb04] ss:$8 sps:$4 sm:$0xff]   ;;  %v7792_v60 = vrot.slane %v7565_v22, %v6863_v49  ;;  %v6227_v22 = vld [vmem:[%s8806_s1 + $0x514] ss:$8 sps:$4 sm:$0xff]  }
 0x109   :  { %3767 = vmatprep.subr.bf16.mxu0 %v6139_v61  ;;  %v7796_v61 = vrot.slane %v7568_v35, %v6863_v49  ;;  %v6230_v35 = vld [vmem:[%s8806_s1 + $0xb14] ss:$8 sps:$4 sm:$0xff]  }
 0x10b   :  { %3522 = vmatpush1.bf16.msra.mxu1 %v6134_v62  ;;  %v6218_v62 = vld [vmem:[%s8806_s1 + $0x500] ss:$8 sps:$4 sm:$0xff]  }
 0x10c   :  { %3768 = vmatpush1.bf16.msra.mxu0 %v6137_v63  ;;  %3523 = vmatprep.subr.bf16.mxu1 %v6142_v0  ;;  %v6222_v63 = vld [vmem:[%s8806_s1 + $0xb00] ss:$8 sps:$4 sm:$0xff]   ;;  %v661_v0 = vcombine.high %v7609_v58, %v7609_v58  ;;  %v6233_v58 = vld [vmem:[%s8806_s1 + $0x524] ss:$8 sps:$4 sm:$0xff]  }
 0x10d   :  { %3769 = vmatprep.subr.bf16.mxu0 %v6145_v1  ;;  %v711_v1 = vcombine.high %v7612_v59, %v7612_v59  ;;  %v6236_v59 = vld [vmem:[%s8806_s1 + $0xb24] ss:$8 sps:$4 sm:$0xff]  }
 0x10f   :  { %3524 = vmatpush1.bf16.msra.mxu1 %v6140_v2  ;;  %v6225_v2 = vld [vmem:[%s8806_s1 + $0x510] ss:$8 sps:$4 sm:$0xff]  }
 0x110   :  { %3770 = vmatpush1.bf16.msra.mxu0 %v6143_v3  ;;  %3525 = vmatprep.subr.bf16.mxu1 %v6148_v4  ;;  %v6228_v3 = vld [vmem:[%s8806_s1 + $0xb10] ss:$8 sps:$4 sm:$0xff]   ;;  %v6231_v4 = vld [vmem:[%s8806_s1 + $0x520] ss:$8 sps:$4 sm:$0xff]  }
 0x111   :  { %3771 = vmatprep.subr.bf16.mxu0 %v6151_v5  ;;  %v6234_v5 = vld [vmem:[%s8806_s1 + $0xb20] ss:$8 sps:$4 sm:$0xff]  }
 0x113   :  { %3526 = vmatpush1.bf16.msra.mxu1 %v6146_v6  ;;  %v6239_v6 = vld [vmem:[%s8806_s1 + $0x534] ss:$8 sps:$4 sm:$0xff]  }
 0x114   :  { %3772 = vmatpush1.bf16.msra.mxu0 %v6149_v7  ;;  %3527 = vmatprep.subr.bf16.mxu1 %v6154_v8  ;;  %v6242_v7 = vld [vmem:[%s8806_s1 + $0xb34] ss:$8 sps:$4 sm:$0xff]   ;;  %v6237_v8 = vld [vmem:[%s8806_s1 + $0x530] ss:$8 sps:$4 sm:$0xff]  }
 0x115   :  { %3773 = vmatprep.subr.bf16.mxu0 %v6157_v9  ;;  %v6240_v9 = vld [vmem:[%s8806_s1 + $0xb30] ss:$8 sps:$4 sm:$0xff]  }
 0x117   :  { %3528 = vmatpush1.bf16.msra.mxu1 %v6152_v10  ;;  %v6245_v10 = vld [vmem:[%s8806_s1 + $0x544] ss:$8 sps:$4 sm:$0xff]  }
 0x118   :  { %3774 = vmatpush1.bf16.msra.mxu0 %v6155_v11  ;;  %3529 = vmatprep.subr.bf16.mxu1 %v6160_v12  ;;  %v6248_v11 = vld [vmem:[%s8806_s1 + $0xb44] ss:$8 sps:$4 sm:$0xff]   ;;  %v6243_v12 = vld [vmem:[%s8806_s1 + $0x540] ss:$8 sps:$4 sm:$0xff]  }
 0x119   :  { %3775 = vmatprep.subr.bf16.mxu0 %v6163_v13  ;;  %v6246_v13 = vld [vmem:[%s8806_s1 + $0xb40] ss:$8 sps:$4 sm:$0xff]  }
 0x11b   :  { %3530 = vmatpush1.bf16.msra.mxu1 %v6158_v14  ;;  %v6251_v14 = vld [vmem:[%s8806_s1 + $0x554] ss:$8 sps:$4 sm:$0xff]  }
 0x11c   :  { %3776 = vmatpush1.bf16.msra.mxu0 %v6161_v15  ;;  %3531 = vmatprep.subr.bf16.mxu1 %v6166_v16  ;;  %v6254_v15 = vld [vmem:[%s8806_s1 + $0xb54] ss:$8 sps:$4 sm:$0xff]   ;;  %v6249_v16 = vld [vmem:[%s8806_s1 + $0x550] ss:$8 sps:$4 sm:$0xff]  }
 0x11d   :  { %3777 = vmatprep.subr.bf16.mxu0 %v6169_v19  ;;  %v6252_v19 = vld [vmem:[%s8806_s1 + $0xb50] ss:$8 sps:$4 sm:$0xff]  }
 0x11f   :  { %3532 = vmatpush1.bf16.msra.mxu1 %v6164_v20  ;;  %v6257_v20 = vld [vmem:[%s8806_s1 + $0x564] ss:$8 sps:$4 sm:$0xff]  }
 0x120   :  { %3778 = vmatpush1.bf16.msra.mxu0 %v6167_v21  ;;  %3533 = vmatprep.subr.bf16.mxu1 %v6172_v52  ;;  %v6260_v21 = vld [vmem:[%s8806_s1 + $0xb64] ss:$8 sps:$4 sm:$0xff]   ;;  %v6255_v52 = vld [vmem:[%s8806_s1 + $0x560] ss:$8 sps:$4 sm:$0xff]  }
 0x121   :  { %3779 = vmatprep.subr.bf16.mxu0 %v6175_v23  ;;  %v6258_v23 = vld [vmem:[%s8806_s1 + $0xb60] ss:$8 sps:$4 sm:$0xff]  }
 0x123   :  { %3534 = vmatpush1.bf16.msra.mxu1 %v6170_v24  ;;  %v6263_v24 = vld [vmem:[%s8806_s1 + $0x574] ss:$8 sps:$4 sm:$0xff]  }
 0x124   :  { %3780 = vmatpush1.bf16.msra.mxu0 %v6173_v25  ;;  %3535 = vmatprep.subr.bf16.mxu1 %v6178_v26  ;;  %v6266_v25 = vld [vmem:[%s8806_s1 + $0xb74] ss:$8 sps:$4 sm:$0xff]   ;;  %v6261_v26 = vld [vmem:[%s8806_s1 + $0x570] ss:$8 sps:$4 sm:$0xff]  }
 0x125   :  { %3781 = vmatprep.subr.bf16.mxu0 %v6181_v27  ;;  %v6264_v27 = vld [vmem:[%s8806_s1 + $0xb70] ss:$8 sps:$4 sm:$0xff]  }
 0x127   :  { %3536 = vmatpush1.bf16.msra.mxu1 %v6176_v28  ;;  %v6269_v28 = vld [vmem:[%s8806_s1 + $0x584] ss:$8 sps:$4 sm:$0xff]  }
 0x128   :  { %3782 = vmatpush1.bf16.msra.mxu0 %v6179_v29  ;;  %3537 = vmatprep.subr.bf16.mxu1 %v6184_v30  ;;  %v6272_v29 = vld [vmem:[%s8806_s1 + $0xb84] ss:$8 sps:$4 sm:$0xff]   ;;  %v6267_v30 = vld [vmem:[%s8806_s1 + $0x580] ss:$8 sps:$4 sm:$0xff]  }
 0x129   :  { %3783 = vmatprep.subr.bf16.mxu0 %v6187_v31  ;;  %v6270_v31 = vld [vmem:[%s8806_s1 + $0xb80] ss:$8 sps:$4 sm:$0xff]  }
 0x12b   :  { %3538 = vmatpush1.bf16.msra.mxu1 %v6182_v32  ;;  %v6275_v32 = vld [vmem:[%s8806_s1 + $0x594] ss:$8 sps:$4 sm:$0xff]  }
 0x12c   :  { %3784 = vmatpush1.bf16.msra.mxu0 %v6185_v17  ;;  %3539 = vmatprep.subr.bf16.mxu1 %v6190_v34  ;;  %v6278_v17 = vld [vmem:[%s8806_s1 + $0xb94] ss:$8 sps:$4 sm:$0xff]   ;;  %v6273_v34 = vld [vmem:[%s8806_s1 + $0x590] ss:$8 sps:$4 sm:$0xff]  }
 0x12d   :  { %3785 = vmatprep.subr.bf16.mxu0 %v6193_v36  ;;  %v6276_v36 = vld [vmem:[%s8806_s1 + $0xb90] ss:$8 sps:$4 sm:$0xff]  }
 0x12f   :  { %3540 = vmatpush1.bf16.msra.mxu1 %v6188_v37  ;;  %v6281_v37 = vld [vmem:[%s8806_s1 + $0x5a4] ss:$8 sps:$4 sm:$0xff]  }
 0x130   :  { %3786 = vmatpush1.bf16.msra.mxu0 %v6191_v38  ;;  %3541 = vmatprep.subr.bf16.mxu1 %v6196_v39  ;;  %v6284_v38 = vld [vmem:[%s8806_s1 + $0xba4] ss:$8 sps:$4 sm:$0xff]   ;;  %v6279_v39 = vld [vmem:[%s8806_s1 + $0x5a0] ss:$8 sps:$4 sm:$0xff]  }
 0x131   :  { %3787 = vmatprep.subr.bf16.mxu0 %v6199_v44  ;;  %v6282_v44 = vld [vmem:[%s8806_s1 + $0xba0] ss:$8 sps:$4 sm:$0xff]  }
 0x133   :  { %3542 = vmatpush1.bf16.msra.mxu1 %v6194_v45  ;;  %v6287_v45 = vld [vmem:[%s8806_s1 + $0x5b4] ss:$8 sps:$4 sm:$0xff]  }
 0x134   :  { %3788 = vmatpush1.bf16.msra.mxu0 %v6197_v33  ;;  %3543 = vmatprep.subr.bf16.mxu1 %v6202_v46  ;;  %v6290_v33 = vld [vmem:[%s8806_s1 + $0xbb4] ss:$8 sps:$4 sm:$0xff]   ;;  %v6285_v46 = vld [vmem:[%s8806_s1 + $0x5b0] ss:$8 sps:$4 sm:$0xff]  }
 0x135   :  { %3789 = vmatprep.subr.bf16.mxu0 %v6205_v47  ;;  %v6288_v47 = vld [vmem:[%s8806_s1 + $0xbb0] ss:$8 sps:$4 sm:$0xff]  }
 0x137   :  { %3544 = vmatpush1.bf16.msra.mxu1 %v6200_v48  ;;  %v6293_v48 = vld [vmem:[%s8806_s1 + $0x5c4] ss:$8 sps:$4 sm:$0xff]  }
 0x138   :  { %3790 = vmatpush1.bf16.msra.mxu0 %v6203_v18  ;;  %3545 = vmatprep.subr.bf16.mxu1 %v6208_v41  ;;  %v6296_v18 = vld [vmem:[%s8806_s1 + $0xbc4] ss:$8 sps:$4 sm:$0xff]   ;;  %v6291_v41 = vld [vmem:[%s8806_s1 + $0x5c0] ss:$8 sps:$4 sm:$0xff]  }
 0x139   :  { %3791 = vmatprep.subr.bf16.mxu0 %v6211_v50  ;;  %v6294_v50 = vld [vmem:[%s8806_s1 + $0xbc0] ss:$8 sps:$4 sm:$0xff]  }
 0x13b   :  { %3546 = vmatpush1.bf16.msra.mxu1 %v6206_v51  ;;  %v6299_v51 = vld [vmem:[%s8806_s1 + $0x5d4] ss:$8 sps:$4 sm:$0xff]  }
 0x13c   :  { %3792 = vmatpush1.bf16.msra.mxu0 %v6209_v53  ;;  %3547 = vmatprep.subr.bf16.mxu1 %v6214_v54  ;;  %v6302_v53 = vld [vmem:[%s8806_s1 + $0xbd4] ss:$8 sps:$4 sm:$0xff]   ;;  %v6297_v54 = vld [vmem:[%s8806_s1 + $0x5d0] ss:$8 sps:$4 sm:$0xff]  }
 0x13d   :  { %3793 = vmatprep.subr.bf16.mxu0 %v6217_v55  ;;  %v6300_v55 = vld [vmem:[%s8806_s1 + $0xbd0] ss:$8 sps:$4 sm:$0xff]  }
 0x13f   :  { %3548 = vmatpush1.bf16.msra.mxu1 %v6212_v56  ;;  %v6305_v56 = vld [vmem:[%s8806_s1 + $0x5e4] ss:$8 sps:$4 sm:$0xff]  }
 0x140   :  { %3794 = vmatpush1.bf16.msra.mxu0 %v6215_v57  ;;  %3558 = vmatprep.subr.bf16.mxu1 %v6220_v40  ;;  %v6308_v57 = vld [vmem:[%s8806_s1 + $0xbe4] ss:$8 sps:$4 sm:$0xff]   ;;  %v7975_v40 = vld [vmem:[%s8807_s0 + $0x18] sm:$0xff] }
 0x141   :  { %3804 = vmatprep.subr.bf16.mxu0 %v6224_v43  ;;  %v6303_v43 = vld [vmem:[%s8806_s1 + $0x5e0] ss:$8 sps:$4 sm:$0xff]  }
 0x142   :  { %3550 = vmatmul.mubr.bf16.vlgmr.msra.gmra.mrb[0].mxu1 %v7792_v60 }
 0x143   :  { %3796 = vmatmul.mubr.bf16.vlgmr.msra.gmra.mrb[0].mxu0 %v7796_v61  ;;  %3559 = vmatpush1.bf16.msra.mxu1 %v6218_v62  ;;  %v6306_v62 = vld [vmem:[%s8806_s1 + $0xbe0] ss:$8 sps:$4 sm:$0xff]  }
 0x144   :  { %3805 = vmatpush1.bf16.msra.mxu0 %v6222_v63  ;;  %3560 = vmatprep.subr.bf16.mxu1 %v6227_v22  ;;  %v7985_v63 = vrot.slane %v7975_v40, %v6863_v49  ;;  %v6311_v22 = vld [vmem:[%s8806_s1 + $0x5f4] ss:$8 sps:$4 sm:$0xff]  }
 0x145   :  { %3806 = vmatprep.subr.bf16.mxu0 %v6230_v35  ;;  %3590 = vmatprep.mubr.bf16.mxu1 %v661_v0  ;;  %v6314_v35 = vld [vmem:[%s8806_s1 + $0xbf4] ss:$8 sps:$4 sm:$0xff]   ;;  %v6309_v0 = vld [vmem:[%s8806_s1 + $0x5f0] ss:$8 sps:$4 sm:$0xff]  }
 0x146   :  { %3836 = vmatprep.mubr.bf16.mxu0 %v711_v1  ;;  %v6312_v1 = vld [vmem:[%s8806_s1 + $0xbf0] ss:$8 sps:$4 sm:$0xff]  }
 0x147   :  { %3561 = vmatpush1.bf16.msra.mxu1 %v6225_v2  ;;  %v727_v2 = vcombine.high %v7985_v63, %v7985_v63 }
 0x148   :  { %3807 = vmatpush1.bf16.msra.mxu0 %v6228_v3  ;;  %3562 = vmatprep.subr.bf16.mxu1 %v6233_v58  ;;  %v6317_v3 = vld [vmem:[%s8806_s1 + $0xc04] ss:$8 sps:$4 sm:$0xff]   ;;  %v659_v58 = vcombine.high %v7792_v60, %v7792_v60  ;;  %v6318_v60 = vld [vmem:[%s8806_s1 + $0xc10] ss:$8 sps:$4 sm:$0xff]  }
 0x149   :  { %3808 = vmatprep.subr.bf16.mxu0 %v6236_v59  ;;  %v709_v59 = vcombine.high %v7796_v61, %v7796_v61  ;;  %v6323_v61 = vld [vmem:[%s8806_s1 + $0xc24] ss:$8 sps:$4 sm:$0xff]  }
 0x14b   :  { %3563 = vmatpush1.bf16.msra.mxu1 %v6231_v4  ;;  %v6315_v4 = vld [vmem:[%s8806_s1 + $0xc00] ss:$8 sps:$4 sm:$0xff]  }
 0x14c   :  { %3809 = vmatpush1.bf16.msra.mxu0 %v6234_v5  ;;  %3564 = vmatprep.subr.bf16.mxu1 %v6239_v6  ;;  %v8012_v5 = vrot.slane %v727_v2, %v6863_v49  ;;  %v6320_v6 = vld [vmem:[%s8806_s1 + $0xc14] ss:$8 sps:$4 sm:$0xff]   ;;  %v6396_v2 = vld [vmem:[%s8806_s1 + $0xdb0] ss:$8 sps:$4 sm:$0xff]  }
 0x14d   :  { %3810 = vmatprep.subr.bf16.mxu0 %v6242_v7  ;;  %v6321_v7 = vld [vmem:[%s8806_s1 + $0xc20] ss:$8 sps:$4 sm:$0xff]  }
 0x14f   :  { %3565 = vmatpush1.bf16.msra.mxu1 %v6237_v8  ;;  %v6326_v8 = vld [vmem:[%s8806_s1 + $0xc34] ss:$8 sps:$4 sm:$0xff]  }
 0x150   :  { %3811 = vmatpush1.bf16.msra.mxu0 %v6240_v9  ;;  %3566 = vmatprep.subr.bf16.mxu1 %v6245_v10  ;;  %v6324_v9 = vld [vmem:[%s8806_s1 + $0xc30] ss:$8 sps:$4 sm:$0xff]   ;;  %v6329_v10 = vld [vmem:[%s8806_s1 + $0xc44] ss:$8 sps:$4 sm:$0xff]  }
 0x151   :  { %3812 = vmatprep.subr.bf16.mxu0 %v6248_v11  ;;  %v6327_v11 = vld [vmem:[%s8806_s1 + $0xc40] ss:$8 sps:$4 sm:$0xff]  }
 0x153   :  { %3567 = vmatpush1.bf16.msra.mxu1 %v6243_v12  ;;  %v6332_v12 = vld [vmem:[%s8806_s1 + $0xc54] ss:$8 sps:$4 sm:$0xff]  }
 0x154   :  { %3813 = vmatpush1.bf16.msra.mxu0 %v6246_v13  ;;  %3568 = vmatprep.subr.bf16.mxu1 %v6251_v14  ;;  %v6330_v13 = vld [vmem:[%s8806_s1 + $0xc50] ss:$8 sps:$4 sm:$0xff]   ;;  %v6335_v14 = vld [vmem:[%s8806_s1 + $0xc64] ss:$8 sps:$4 sm:$0xff]  }
 0x155   :  { %3814 = vmatprep.subr.bf16.mxu0 %v6254_v15  ;;  %v6333_v15 = vld [vmem:[%s8806_s1 + $0xc60] ss:$8 sps:$4 sm:$0xff]  }
 0x157   :  { %3569 = vmatpush1.bf16.msra.mxu1 %v6249_v16  ;;  %v6338_v16 = vld [vmem:[%s8806_s1 + $0xc74] ss:$8 sps:$4 sm:$0xff]  }
 0x158   :  { %3815 = vmatpush1.bf16.msra.mxu0 %v6252_v19  ;;  %3570 = vmatprep.subr.bf16.mxu1 %v6257_v20  ;;  %v6336_v19 = vld [vmem:[%s8806_s1 + $0xc70] ss:$8 sps:$4 sm:$0xff]   ;;  %v6341_v20 = vld [vmem:[%s8806_s1 + $0xc84] ss:$8 sps:$4 sm:$0xff]  }
 0x159   :  { %3816 = vmatprep.subr.bf16.mxu0 %v6260_v21  ;;  %v6339_v21 = vld [vmem:[%s8806_s1 + $0xc80] ss:$8 sps:$4 sm:$0xff]  }
 0x15b   :  { %3571 = vmatpush1.bf16.msra.mxu1 %v6255_v52  ;;  %v6344_v52 = vld [vmem:[%s8806_s1 + $0xc94] ss:$8 sps:$4 sm:$0xff]  }
 0x15c   :  { %3817 = vmatpush1.bf16.msra.mxu0 %v6258_v23  ;;  %3572 = vmatprep.subr.bf16.mxu1 %v6263_v24  ;;  %v6342_v23 = vld [vmem:[%s8806_s1 + $0xc90] ss:$8 sps:$4 sm:$0xff]   ;;  %v6347_v24 = vld [vmem:[%s8806_s1 + $0xca4] ss:$8 sps:$4 sm:$0xff]  }
 0x15d   :  { %3818 = vmatprep.subr.bf16.mxu0 %v6266_v25  ;;  %v6345_v25 = vld [vmem:[%s8806_s1 + $0xca0] ss:$8 sps:$4 sm:$0xff]  }
 0x15f   :  { %3573 = vmatpush1.bf16.msra.mxu1 %v6261_v26  ;;  %v6350_v26 = vld [vmem:[%s8806_s1 + $0xcb4] ss:$8 sps:$4 sm:$0xff]  }
 0x160   :  { %3819 = vmatpush1.bf16.msra.mxu0 %v6264_v27  ;;  %3574 = vmatprep.subr.bf16.mxu1 %v6269_v28  ;;  %v6348_v27 = vld [vmem:[%s8806_s1 + $0xcb0] ss:$8 sps:$4 sm:$0xff]   ;;  %v6353_v28 = vld [vmem:[%s8806_s1 + $0xcc4] ss:$8 sps:$4 sm:$0xff]  }
 0x161   :  { %3820 = vmatprep.subr.bf16.mxu0 %v6272_v29  ;;  %v6351_v29 = vld [vmem:[%s8806_s1 + $0xcc0] ss:$8 sps:$4 sm:$0xff]  }
 0x163   :  { %3575 = vmatpush1.bf16.msra.mxu1 %v6267_v30  ;;  %v6356_v30 = vld [vmem:[%s8806_s1 + $0xcd4] ss:$8 sps:$4 sm:$0xff]  }
 0x164   :  { %3821 = vmatpush1.bf16.msra.mxu0 %v6270_v31  ;;  %3576 = vmatprep.subr.bf16.mxu1 %v6275_v32  ;;  %v6354_v31 = vld [vmem:[%s8806_s1 + $0xcd0] ss:$8 sps:$4 sm:$0xff]   ;;  %v6359_v32 = vld [vmem:[%s8806_s1 + $0xce4] ss:$8 sps:$4 sm:$0xff]  }
 0x165   :  { %3822 = vmatprep.subr.bf16.mxu0 %v6278_v17  ;;  %v6357_v17 = vld [vmem:[%s8806_s1 + $0xce0] ss:$8 sps:$4 sm:$0xff]  }
 0x167   :  { %3577 = vmatpush1.bf16.msra.mxu1 %v6273_v34  ;;  %v6362_v34 = vld [vmem:[%s8806_s1 + $0xcf4] ss:$8 sps:$4 sm:$0xff]  }
 0x168   :  { %3823 = vmatpush1.bf16.msra.mxu0 %v6276_v36  ;;  %3578 = vmatprep.subr.bf16.mxu1 %v6281_v37  ;;  %v6360_v36 = vld [vmem:[%s8806_s1 + $0xcf0] ss:$8 sps:$4 sm:$0xff]   ;;  %v6365_v37 = vld [vmem:[%s8806_s1 + $0xd04] ss:$8 sps:$4 sm:$0xff]  }
 0x169   :  { %3824 = vmatprep.subr.bf16.mxu0 %v6284_v38  ;;  %v8110_v38 = vrot.slane %v7985_v63, %v6863_v49  ;;  %v6392_v63 = vld [vmem:[%s8806_s1 + $0xd94] ss:$8 sps:$4 sm:$0xff]  }
 0x16b   :  { %3579 = vmatpush1.bf16.msra.mxu1 %v6279_v39  ;;  %v6363_v39 = vld [vmem:[%s8806_s1 + $0xd00] ss:$8 sps:$4 sm:$0xff]  }
 0x16c   :  { %3825 = vmatpush1.bf16.msra.mxu0 %v6282_v44  ;;  %3580 = vmatprep.subr.bf16.mxu1 %v6287_v45  ;;  %v759_v44 = vcombine.high %v8012_v5, %v8012_v5  ;;  %v6368_v45 = vld [vmem:[%s8806_s1 + $0xd14] ss:$8 sps:$4 sm:$0xff]  }
 0x16d   :  { %3826 = vmatprep.subr.bf16.mxu0 %v6290_v33  ;;  %v6366_v33 = vld [vmem:[%s8806_s1 + $0xd10] ss:$8 sps:$4 sm:$0xff]  }
 0x16f   :  { %3581 = vmatpush1.bf16.msra.mxu1 %v6285_v46  ;;  %v6371_v46 = vld [vmem:[%s8806_s1 + $0xd24] ss:$8 sps:$4 sm:$0xff]  }
 0x170   :  { %3827 = vmatpush1.bf16.msra.mxu0 %v6288_v47  ;;  %3582 = vmatprep.subr.bf16.mxu1 %v6293_v48  ;;  %v6369_v47 = vld [vmem:[%s8806_s1 + $0xd20] ss:$8 sps:$4 sm:$0xff]   ;;  %v6374_v48 = vld [vmem:[%s8806_s1 + $0xd34] ss:$8 sps:$4 sm:$0xff]  }
 0x171   :  { %3828 = vmatprep.subr.bf16.mxu0 %v6296_v18  ;;  %v6372_v18 = vld [vmem:[%s8806_s1 + $0xd30] ss:$8 sps:$4 sm:$0xff]  }
 0x173   :  { %3583 = vmatpush1.bf16.msra.mxu1 %v6291_v41  ;;  %v6377_v41 = vld [vmem:[%s8806_s1 + $0xd44] ss:$8 sps:$4 sm:$0xff]  }
 0x174   :  { %3829 = vmatpush1.bf16.msra.mxu0 %v6294_v50  ;;  %3584 = vmatprep.subr.bf16.mxu1 %v6299_v51  ;;  %v6375_v50 = vld [vmem:[%s8806_s1 + $0xd40] ss:$8 sps:$4 sm:$0xff]   ;;  %v6380_v51 = vld [vmem:[%s8806_s1 + $0xd54] ss:$8 sps:$4 sm:$0xff]  }
 0x175   :  { %3830 = vmatprep.subr.bf16.mxu0 %v6302_v53  ;;  %v6378_v53 = vld [vmem:[%s8806_s1 + $0xd50] ss:$8 sps:$4 sm:$0xff]  }
 0x177   :  { %3585 = vmatpush1.bf16.msra.mxu1 %v6297_v54  ;;  %v6383_v54 = vld [vmem:[%s8806_s1 + $0xd64] ss:$8 sps:$4 sm:$0xff]  }
 0x178   :  { %3831 = vmatpush1.bf16.msra.mxu0 %v6300_v55  ;;  %3586 = vmatprep.subr.bf16.mxu1 %v6305_v56  ;;  %v6381_v55 = vld [vmem:[%s8806_s1 + $0xd60] ss:$8 sps:$4 sm:$0xff]   ;;  %v6386_v56 = vld [vmem:[%s8806_s1 + $0xd74] ss:$8 sps:$4 sm:$0xff]  }
 0x179   :  { %3832 = vmatprep.subr.bf16.mxu0 %v6308_v57  ;;  %v6384_v57 = vld [vmem:[%s8806_s1 + $0xd70] ss:$8 sps:$4 sm:$0xff]  }
 0x17b   :  { %3587 = vmatpush1.bf16.msra.mxu1 %v6303_v43  ;;  %v6389_v43 = vld [vmem:[%s8806_s1 + $0xd84] ss:$8 sps:$4 sm:$0xff]  }
 0x17c   :  { %3833 = vmatpush1.bf16.msra.mxu0 %v6306_v62  ;;  %3588 = vmatprep.subr.bf16.mxu1 %v6311_v22  ;;  %v6387_v62 = vld [vmem:[%s8806_s1 + $0xd80] ss:$8 sps:$4 sm:$0xff]   ;;  %v6390_v22 = vld [vmem:[%s8806_s1 + $0xd90] ss:$8 sps:$4 sm:$0xff]  }
 0x17d   :  { %3834 = vmatprep.subr.bf16.mxu0 %v6314_v35  ;;  %v6395_v35 = vld [vmem:[%s8806_s1 + $0xda4] ss:$8 sps:$4 sm:$0xff]  }
 0x17f   :  { %3589 = vmatpush1.bf16.msra.mxu1 %v6309_v0  ;;  %v6393_v0 = vld [vmem:[%s8806_s1 + $0xda0] ss:$8 sps:$4 sm:$0xff]  }
 0x180   :  { %3835 = vmatpush1.bf16.msra.mxu0 %v6312_v1  ;;  %v6398_v1 = vld [vmem:[%s8806_s1 + $0xdb4] ss:$8 sps:$4 sm:$0xff]  }
 0x181   :  { %3845 = vmatprep.subr.bf16.mxu0 %v6317_v3  ;;  %v6401_v3 = vld [vmem:[%s8806_s1 + $0xdc4] ss:$8 sps:$4 sm:$0xff]  }
 0x182   :  { %3591 = vmatmul.mubr.bf16.vlgmr.msra.gmra.mrb[0].mxu1 %v659_v58  ;;  %v6399_v58 = vld [vmem:[%s8806_s1 + $0xdc0] ss:$8 sps:$4 sm:$0xff]  }
 0x183   :  { %3837 = vmatmul.mubr.bf16.vlgmr.msra.gmra.mrb[0].mxu0 %v709_v59  ;;  %v6404_v59 = vld [vmem:[%s8806_s1 + $0xdd4] ss:$8 sps:$4 sm:$0xff]  }
 0x184   :  { %3846 = vmatpush1.bf16.msra.mxu0 %v6315_v4  ;;  %3877 = vmatprep.mubr.bf16.mxu0 %v8012_v5  ;;  %v6402_v4 = vld [vmem:[%s8806_s1 + $0xdd0] ss:$8 sps:$4 sm:$0xff]   ;;  %v712_v5 = vcombine.high %v7975_v40, %v7975_v40 }
 0x185   :  { %3847 = vmatprep.subr.bf16.mxu0 %v6320_v6  ;;  %v6407_v6 = vld [vmem:[%s8806_s1 + $0xde4] ss:$8 sps:$4 sm:$0xff]   ;;  %v6408_v40 = vld [vmem:[%s8806_s1 + $0xdf0] ss:$8 sps:$4 sm:$0xff]  }
 0x188   :  { %3848 = vmatpush1.bf16.msra.mxu0 %v6318_v60  ;;  %v6405_v60 = vld [vmem:[%s8806_s1 + $0xde0] ss:$8 sps:$4 sm:$0xff]  }
 0x189   :  { %3849 = vmatprep.subr.bf16.mxu0 %v6323_v61  ;;  %v8205_v61 = vrot.slane %v712_v5, %v6863_v49  ;;  %v6544_v5 = vld [vmem:[%s8808_s3 + $0x120] ss:$12 sps:$4 sm:$0xff]  }
 0x18c   :  { %3850 = vmatpush1.bf16.msra.mxu0 %v6321_v7  ;;  %v6410_v7 = vld [vmem:[%s8806_s1 + $0xdf4] ss:$8 sps:$4 sm:$0xff]  }
 0x18d   :  { %3851 = vmatprep.subr.bf16.mxu0 %v6326_v8  ;;  %v728_v8 = vcombine.high %v8205_v61, %v8205_v61 }
 0x190   :  { %3852 = vmatpush1.bf16.msra.mxu0 %v6324_v9  ;;  %v6413_v9 = vld [vmem:[%s8806_s1 + $0xe04] ss:$8 sps:$4 sm:$0xff]  }
 0x191   :  { %3853 = vmatprep.subr.bf16.mxu0 %v6329_v10  ;;  %v757_v10 = vcombine.high %v8110_v38, %v8110_v38 }
 0x194   :  { %3854 = vmatpush1.bf16.msra.mxu0 %v6327_v11  ;;  %v6411_v11 = vld [vmem:[%s8806_s1 + $0xe00] ss:$8 sps:$4 sm:$0xff]  }
 0x195   :  { %3855 = vmatprep.subr.bf16.mxu0 %v6332_v12  ;;  %v8224_v12 = vrot.slane %v728_v8, %v6863_v49  ;;  %v6458_v8 = vld [vmem:[%s8806_s1 + $0xef4] ss:$8 sps:$4 sm:$0xff]  }
 0x198   :  { %3856 = vmatpush1.bf16.msra.mxu0 %v6330_v13  ;;  %v6416_v13 = vld [vmem:[%s8806_s1 + $0xe14] ss:$8 sps:$4 sm:$0xff]  }
 0x199   :  { %3857 = vmatprep.subr.bf16.mxu0 %v6335_v14  ;;  %v6414_v14 = vld [vmem:[%s8806_s1 + $0xe10] ss:$8 sps:$4 sm:$0xff]  }
 0x19c   :  { %3858 = vmatpush1.bf16.msra.mxu0 %v6333_v15  ;;  %v6419_v15 = vld [vmem:[%s8806_s1 + $0xe24] ss:$8 sps:$4 sm:$0xff]  }
 0x19d   :  { %3859 = vmatprep.subr.bf16.mxu0 %v6338_v16  ;;  %v6508_v16 = vld [vmem:[%s8808_s3] ss:$12 sps:$4 sm:$0xff]  }
 0x1a0   :  { %3860 = vmatpush1.bf16.msra.mxu0 %v6336_v19  ;;  %v6510_v19 = vld [vmem:[%s8808_s3 + $0x4] ss:$12 sps:$4 sm:$0xff]  }
 0x1a1   :  { %3861 = vmatprep.subr.bf16.mxu0 %v6341_v20  ;;  %v6513_v20 = vld [vmem:[%s8808_s3 + $0x1c] ss:$12 sps:$4 sm:$0xff]   ;;  %4350 = vmatprep.subr.bf16.mxu1 %v6510_v19  ;;  %v6469_v19 = vld [vmem:[%s8806_s1 + $0xf30] ss:$8 sps:$4 sm:$0xff]  }
 0x1a2   :  { %4351 = vmatpush1.bf16.msra.mxu1 %v6508_v16  ;;  %v6471_v16 = vld [vmem:[%s8806_s1 + $0xf34] ss:$8 sps:$4 sm:$0xff]  }
 0x1a3   :  { %4352 = vmatprep.subr.bf16.mxu1 %v6513_v20  ;;  %v6474_v20 = vld [vmem:[%s8806_s1 + $0xf44] ss:$8 sps:$4 sm:$0xff]  }
 0x1a4   :  { %3862 = vmatpush1.bf16.msra.mxu0 %v6339_v21  ;;  %v6417_v21 = vld [vmem:[%s8806_s1 + $0xe20] ss:$8 sps:$4 sm:$0xff]  }
 0x1a5   :  { %3863 = vmatprep.subr.bf16.mxu0 %v6344_v52  ;;  %v6422_v52 = vld [vmem:[%s8806_s1 + $0xe34] ss:$8 sps:$4 sm:$0xff]  }
 0x1a8   :  { %3864 = vmatpush1.bf16.msra.mxu0 %v6342_v23  ;;  %v6511_v23 = vld [vmem:[%s8808_s3 + $0x18] ss:$12 sps:$4 sm:$0xff]  }
 0x1a9   :  { %3865 = vmatprep.subr.bf16.mxu0 %v6347_v24  ;;  %v6516_v24 = vld [vmem:[%s8808_s3 + $0x34] ss:$12 sps:$4 sm:$0xff]   ;;  %4353 = vmatpush1.bf16.msra.mxu1 %v6511_v23  ;;  %v6475_v23 = vld [vmem:[%s8806_s1 + $0xf50] ss:$8 sps:$4 sm:$0xff]  }
 0x1aa   :  { %4354 = vmatprep.subr.bf16.mxu1 %v6516_v24  ;;  %v6480_v24 = vld [vmem:[%s8806_s1 + $0xf64] ss:$8 sps:$4 sm:$0xff]  }
 0x1ac   :  { %3866 = vmatpush1.bf16.msra.mxu0 %v6345_v25  ;;  %v6420_v25 = vld [vmem:[%s8806_s1 + $0xe30] ss:$8 sps:$4 sm:$0xff]  }
 0x1ad   :  { %3867 = vmatprep.subr.bf16.mxu0 %v6350_v26  ;;  %v6425_v26 = vld [vmem:[%s8806_s1 + $0xe44] ss:$8 sps:$4 sm:$0xff]  }
 0x1b0   :  { %3868 = vmatpush1.bf16.msra.mxu0 %v6348_v27  ;;  %v6514_v27 = vld [vmem:[%s8808_s3 + $0x30] ss:$12 sps:$4 sm:$0xff]  }
 0x1b1   :  { %3869 = vmatprep.subr.bf16.mxu0 %v6353_v28  ;;  %v6519_v28 = vld [vmem:[%s8808_s3 + $0x4c] ss:$12 sps:$4 sm:$0xff]   ;;  %4355 = vmatpush1.bf16.msra.mxu1 %v6514_v27 }
 0x1b2   :  { %4356 = vmatprep.subr.bf16.mxu1 %v6519_v28  ;;  %v6478_v28 = vld [vmem:[%s8806_s1 + $0xf60] ss:$8 sps:$4 sm:$0xff]  }
 0x1b4   :  { %3870 = vmatpush1.bf16.msra.mxu0 %v6351_v29  ;;  %v6423_v29 = vld [vmem:[%s8806_s1 + $0xe40] ss:$8 sps:$4 sm:$0xff]  }
 0x1b5   :  { %3871 = vmatprep.subr.bf16.mxu0 %v6356_v30  ;;  %v6428_v30 = vld [vmem:[%s8806_s1 + $0xe54] ss:$8 sps:$4 sm:$0xff]  }
 0x1b8   :  { %3872 = vmatpush1.bf16.msra.mxu0 %v6354_v31  ;;  %v6517_v31 = vld [vmem:[%s8808_s3 + $0x48] ss:$12 sps:$4 sm:$0xff]  }
 0x1b9   :  { %3873 = vmatprep.subr.bf16.mxu0 %v6359_v32  ;;  %v6522_v32 = vld [vmem:[%s8808_s3 + $0x64] ss:$12 sps:$4 sm:$0xff]   ;;  %4357 = vmatpush1.bf16.msra.mxu1 %v6517_v31 }
 0x1ba   :  { %4358 = vmatprep.subr.bf16.mxu1 %v6522_v32  ;;  %v6481_v31 = vld [vmem:[%s8806_s1 + $0xf70] ss:$8 sps:$4 sm:$0xff]   ;;  %v6486_v32 = vld [vmem:[%s8806_s1 + $0xf84] ss:$8 sps:$4 sm:$0xff]  }
 0x1bc   :  { %3874 = vmatpush1.bf16.msra.mxu0 %v6357_v17  ;;  %v6426_v17 = vld [vmem:[%s8806_s1 + $0xe50] ss:$8 sps:$4 sm:$0xff]  }
 0x1bd   :  { %3875 = vmatprep.subr.bf16.mxu0 %v6362_v34  ;;  %v6431_v34 = vld [vmem:[%s8806_s1 + $0xe64] ss:$8 sps:$4 sm:$0xff]  }
 0x1c0   :  { %3876 = vmatpush1.bf16.msra.mxu0 %v6360_v36  ;;  %v6520_v36 = vld [vmem:[%s8808_s3 + $0x60] ss:$12 sps:$4 sm:$0xff]  }
 0x1c1   :  { %3886 = vmatprep.subr.bf16.mxu0 %v6365_v37  ;;  %v6525_v37 = vld [vmem:[%s8808_s3 + $0x7c] ss:$12 sps:$4 sm:$0xff]   ;;  %4359 = vmatpush1.bf16.msra.mxu1 %v6520_v36  ;;  %v6487_v36 = vld [vmem:[%s8806_s1 + $0xf90] ss:$8 sps:$4 sm:$0xff]  }
 0x1c2   :  { %4360 = vmatprep.subr.bf16.mxu1 %v6525_v37  ;;  %v6492_v37 = vld [vmem:[%s8806_s1 + $0xfa4] ss:$8 sps:$4 sm:$0xff]  }
 0x1c3   :  { %3878 = vmatmul.mubr.bf16.vlgmr.msra.gmra.mrb[0].mxu0 %v8110_v38  ;;  %v6429_v38 = vld [vmem:[%s8806_s1 + $0xe60] ss:$8 sps:$4 sm:$0xff]  }
 0x1c4   :  { %3887 = vmatpush1.bf16.msra.mxu0 %v6363_v39  ;;  %3918 = vmatprep.mubr.bf16.mxu0 %v759_v44  ;;  %v6523_v39 = vld [vmem:[%s8808_s3 + $0x78] ss:$12 sps:$4 sm:$0xff]   ;;  %v6434_v44 = vld [vmem:[%s8806_s1 + $0xe74] ss:$8 sps:$4 sm:$0xff]  }
 0x1c5   :  { %3888 = vmatprep.subr.bf16.mxu0 %v6368_v45  ;;  %v6528_v45 = vld [vmem:[%s8808_s3 + $0x94] ss:$12 sps:$4 sm:$0xff]   ;;  %4361 = vmatpush1.bf16.msra.mxu1 %v6523_v39 }
 0x1c6   :  { %4362 = vmatprep.subr.bf16.mxu1 %v6528_v45  ;;  %v6495_v39 = vld [vmem:[%s8806_s1 + $0xfb4] ss:$8 sps:$4 sm:$0xff]   ;;  %v6498_v45 = vld [vmem:[%s8806_s1 + $0xfc4] ss:$8 sps:$4 sm:$0xff]  }
 0x1c8   :  { %3889 = vmatpush1.bf16.msra.mxu0 %v6366_v33  ;;  %v6432_v33 = vld [vmem:[%s8806_s1 + $0xe70] ss:$8 sps:$4 sm:$0xff]  }
 0x1c9   :  { %3890 = vmatprep.subr.bf16.mxu0 %v6371_v46  ;;  %v6526_v46 = vld [vmem:[%s8808_s3 + $0x90] ss:$12 sps:$4 sm:$0xff]  }
 0x1ca   :  { %4363 = vmatpush1.bf16.msra.mxu1 %v6526_v46  ;;  %v6501_v46 = vld [vmem:[%s8806_s1 + $0xfd4] ss:$8 sps:$4 sm:$0xff]  }
 0x1cc   :  { %3891 = vmatpush1.bf16.msra.mxu0 %v6369_v47  ;;  %v6437_v47 = vld [vmem:[%s8806_s1 + $0xe84] ss:$8 sps:$4 sm:$0xff]  }
 0x1cd   :  { %3892 = vmatprep.subr.bf16.mxu0 %v6374_v48  ;;  %v6531_v48 = vld [vmem:[%s8808_s3 + $0xac] ss:$12 sps:$4 sm:$0xff]  }
 0x1ce   :  { %4364 = vmatprep.subr.bf16.mxu1 %v6531_v48  ;;  %v6504_v48 = vld [vmem:[%s8806_s1 + $0xfe4] ss:$8 sps:$4 sm:$0xff]  }
 0x1d0   :  { %3893 = vmatpush1.bf16.msra.mxu0 %v6372_v18  ;;  %v6435_v18 = vld [vmem:[%s8806_s1 + $0xe80] ss:$8 sps:$4 sm:$0xff]  }
 0x1d1   :  { %3894 = vmatprep.subr.bf16.mxu0 %v6377_v41  ;;  %v6529_v41 = vld [vmem:[%s8808_s3 + $0xa8] ss:$12 sps:$4 sm:$0xff]  }
 0x1d2   :  { %4365 = vmatpush1.bf16.msra.mxu1 %v6529_v41  ;;  %v6507_v41 = vld [vmem:[%s8806_s1 + $0xff4] ss:$8 sps:$4 sm:$0xff]  }
 0x1d4   :  { %3895 = vmatpush1.bf16.msra.mxu0 %v6375_v50  ;;  %v6440_v50 = vld [vmem:[%s8806_s1 + $0xe94] ss:$8 sps:$4 sm:$0xff]  }
 0x1d5   :  { %3896 = vmatprep.subr.bf16.mxu0 %v6380_v51  ;;  %v6534_v51 = vld [vmem:[%s8808_s3 + $0xc4] ss:$12 sps:$4 sm:$0xff]  }
 0x1d6   :  { %4366 = vmatprep.subr.bf16.mxu1 %v6534_v51 }
 0x1d8   :  { %3897 = vmatpush1.bf16.msra.mxu0 %v6378_v53  ;;  %v6438_v53 = vld [vmem:[%s8806_s1 + $0xe90] ss:$8 sps:$4 sm:$0xff]  }
 0x1d9   :  { %3898 = vmatprep.subr.bf16.mxu0 %v6383_v54  ;;  %v6532_v54 = vld [vmem:[%s8808_s3 + $0xc0] ss:$12 sps:$4 sm:$0xff]  }
 0x1da   :  { %4367 = vmatpush1.bf16.msra.mxu1 %v6532_v54  ;;  %v6550_v54 = vld [vmem:[%s8808_s3 + $0x150] ss:$12 sps:$4 sm:$0xff]  }
 0x1dc   :  { %3899 = vmatpush1.bf16.msra.mxu0 %v6381_v55  ;;  %v6443_v55 = vld [vmem:[%s8806_s1 + $0xea4] ss:$8 sps:$4 sm:$0xff]  }
 0x1dd   :  { %3900 = vmatprep.subr.bf16.mxu0 %v6386_v56  ;;  %v6537_v56 = vld [vmem:[%s8808_s3 + $0xdc] ss:$12 sps:$4 sm:$0xff]  }
 0x1de   :  { %4368 = vmatprep.subr.bf16.mxu1 %v6537_v56  ;;  %v6553_v56 = vld [vmem:[%s8808_s3 + $0x168] ss:$12 sps:$4 sm:$0xff]  }
 0x1e0   :  { %3901 = vmatpush1.bf16.msra.mxu0 %v6384_v57  ;;  %v6441_v57 = vld [vmem:[%s8806_s1 + $0xea0] ss:$8 sps:$4 sm:$0xff]  }
 0x1e1   :  { %3902 = vmatprep.subr.bf16.mxu0 %v6389_v43  ;;  %v6535_v43 = vld [vmem:[%s8808_s3 + $0xd8] ss:$12 sps:$4 sm:$0xff]  }
 0x1e2   :  { %4369 = vmatpush1.bf16.msra.mxu1 %v6535_v43  ;;  %v8526_v43 = vsub.s32 0, %v6845_v42 }
 0x1e4   :  { %3903 = vmatpush1.bf16.msra.mxu0 %v6387_v62  ;;  %v6446_v62 = vld [vmem:[%s8806_s1 + $0xeb4] ss:$8 sps:$4 sm:$0xff]  }
 0x1e5   :  { %3904 = vmatprep.subr.bf16.mxu0 %v6392_v63  ;;  %v6540_v63 = vld [vmem:[%s8808_s3 + $0xf4] ss:$12 sps:$4 sm:$0xff]  }
 0x1e6   :  { %4370 = vmatprep.subr.bf16.mxu1 %v6540_v63  ;;  %v8532_v63 = vsub.s32 1, %v6845_v42 }
 0x1e8   :  { %3905 = vmatpush1.bf16.msra.mxu0 %v6390_v22  ;;  %v6444_v22 = vld [vmem:[%s8806_s1 + $0xeb0] ss:$8 sps:$4 sm:$0xff]  }
 0x1e9   :  { %3906 = vmatprep.subr.bf16.mxu0 %v6395_v35  ;;  %v6538_v35 = vld [vmem:[%s8808_s3 + $0xf0] ss:$12 sps:$4 sm:$0xff]  }
 0x1ea   :  { %4371 = vmatpush1.bf16.msra.mxu1 %v6538_v35 }
 0x1ec   :  { %3907 = vmatpush1.bf16.msra.mxu0 %v6393_v0  ;;  %v6449_v0 = vld [vmem:[%s8806_s1 + $0xec4] ss:$8 sps:$4 sm:$0xff]  }
 0x1ed   :  { %3908 = vmatprep.subr.bf16.mxu0 %v6398_v1  ;;  %v6543_v1 = vld [vmem:[%s8808_s3 + $0x10c] ss:$12 sps:$4 sm:$0xff]  }
 0x1ee   :  { %4372 = vmatprep.subr.bf16.mxu1 %v6543_v1 }
 0x1f0   :  { %3909 = vmatpush1.bf16.msra.mxu0 %v6396_v2  ;;  %v6447_v2 = vld [vmem:[%s8806_s1 + $0xec0] ss:$8 sps:$4 sm:$0xff]  }
 0x1f1   :  { %3910 = vmatprep.subr.bf16.mxu0 %v6401_v3  ;;  %v6541_v3 = vld [vmem:[%s8808_s3 + $0x108] ss:$12 sps:$4 sm:$0xff]  }
 0x1f2   :  { %4373 = vmatpush1.bf16.msra.mxu1 %v6541_v3 }
 0x1f4   :  { %3911 = vmatpush1.bf16.msra.mxu0 %v6399_v58  ;;  %v6452_v58 = vld [vmem:[%s8806_s1 + $0xed4] ss:$8 sps:$4 sm:$0xff]  }
 0x1f5   :  { %3912 = vmatprep.subr.bf16.mxu0 %v6404_v59  ;;  %v6546_v59 = vld [vmem:[%s8808_s3 + $0x124] ss:$12 sps:$4 sm:$0xff]  }
 0x1f6   :  { %4374 = vmatprep.subr.bf16.mxu1 %v6546_v59 }
 0x1f7   :  { %4375 = vmatpush1.bf16.msra.mxu1 %v6544_v5 }
 0x1f8   :  { %3913 = vmatpush1.bf16.msra.mxu0 %v6402_v4  ;;  %v6450_v4 = vld [vmem:[%s8806_s1 + $0xed0] ss:$8 sps:$4 sm:$0xff]  }
 0x1f9   :  { %3914 = vmatprep.subr.bf16.mxu0 %v6407_v6  ;;  %v6455_v6 = vld [vmem:[%s8806_s1 + $0xee4] ss:$8 sps:$4 sm:$0xff]  }
 0x1fc   :  { %3915 = vmatpush1.bf16.msra.mxu0 %v6405_v60  ;;  %v6549_v60 = vld [vmem:[%s8808_s3 + $0x13c] ss:$12 sps:$4 sm:$0xff]  }
 0x1fd   :  { %3916 = vmatprep.subr.bf16.mxu0 %v6410_v7  ;;  %v6453_v7 = vld [vmem:[%s8806_s1 + $0xee0] ss:$8 sps:$4 sm:$0xff]   ;;  %4376 = vmatprep.subr.bf16.mxu1 %v6549_v60 }
 0x200   :  { %3917 = vmatpush1.bf16.msra.mxu0 %v6408_v40  ;;  %v6547_v40 = vld [vmem:[%s8808_s3 + $0x138] ss:$12 sps:$4 sm:$0xff]  }
 0x201   :  { %3927 = vmatprep.subr.bf16.mxu0 %v6413_v9  ;;  %v6456_v9 = vld [vmem:[%s8806_s1 + $0xef0] ss:$8 sps:$4 sm:$0xff]   ;;  %4377 = vmatpush1.bf16.msra.mxu1 %v6547_v40  ;;  %v6557_v40 = vld [vmem:[%s8808_s3 + $0x8] ss:$12 sps:$4 sm:$0xff]  }
 0x203   :  { %3919 = vmatmul.mubr.bf16.vlgmr.msra.gmra.mrb[0].mxu0 %v757_v10  ;;  %v6462_v10 = vld [vmem:[%s8806_s1 + $0xf04] ss:$8 sps:$4 sm:$0xff]  }
 0x204   :  { %3928 = vmatpush1.bf16.msra.mxu0 %v6411_v11  ;;  %3959 = vmatprep.mubr.bf16.mxu0 %v8224_v12  ;;  %v8406_v11 = vrot.slane %v8205_v61, %v6863_v49  ;;  %v6463_v49 = vld [vmem:[%s8806_s1 + $0xf10] ss:$8 sps:$4 sm:$0xff]   ;;  %v6468_v61 = vld [vmem:[%s8806_s1 + $0xf24] ss:$8 sps:$4 sm:$0xff]  }
 0x205   :  { %3929 = vmatprep.subr.bf16.mxu0 %v6416_v13  ;;  %v6460_v13 = vld [vmem:[%s8806_s1 + $0xf00] ss:$8 sps:$4 sm:$0xff]  }
 0x206   :  { %v758_v51 = vcombine.high %v8406_v11, %v8406_v11 }
 0x208   :  { %3930 = vmatpush1.bf16.msra.mxu0 %v6414_v14  ;;  %v760_v14 = vcombine.high %v8224_v12, %v8224_v12  ;;  %v6466_v12 = vld [vmem:[%s8806_s1 + $0xf20] ss:$8 sps:$4 sm:$0xff]  }
 0x209   :  { %3931 = vmatprep.subr.bf16.mxu0 %v6419_v15  ;;  %v6465_v15 = vld [vmem:[%s8806_s1 + $0xf14] ss:$8 sps:$4 sm:$0xff]  }
 0x20c   :  { %3932 = vmatpush1.bf16.msra.mxu0 %v6417_v21  ;;  %v6472_v21 = vld [vmem:[%s8806_s1 + $0xf40] ss:$8 sps:$4 sm:$0xff]  }
 0x20d   :  { %3933 = vmatprep.subr.bf16.mxu0 %v6422_v52  ;;  %v6477_v52 = vld [vmem:[%s8806_s1 + $0xf54] ss:$8 sps:$4 sm:$0xff]  }
 0x210   :  { %3934 = vmatpush1.bf16.msra.mxu0 %v6420_v25 }
 0x211   :  { %3935 = vmatprep.subr.bf16.mxu0 %v6425_v26 }
 0x214   :  { %3936 = vmatpush1.bf16.msra.mxu0 %v6423_v29 }
 0x215   :  { %3937 = vmatprep.subr.bf16.mxu0 %v6428_v30  ;;  %v6483_v30 = vld [vmem:[%s8806_s1 + $0xf74] ss:$8 sps:$4 sm:$0xff]  }
 0x218   :  { %3938 = vmatpush1.bf16.msra.mxu0 %v6426_v17  ;;  %v6484_v17 = vld [vmem:[%s8806_s1 + $0xf80] ss:$8 sps:$4 sm:$0xff]  }
 0x219   :  { %3939 = vmatprep.subr.bf16.mxu0 %v6431_v34  ;;  %v6489_v34 = vld [vmem:[%s8806_s1 + $0xf94] ss:$8 sps:$4 sm:$0xff]  }
 0x21c   :  { %3940 = vmatpush1.bf16.msra.mxu0 %v6429_v38  ;;  %v6490_v38 = vld [vmem:[%s8806_s1 + $0xfa0] ss:$8 sps:$4 sm:$0xff]  }
 0x21d   :  { %3941 = vmatprep.subr.bf16.mxu0 %v6434_v44  ;;  %v6493_v44 = vld [vmem:[%s8806_s1 + $0xfb0] ss:$8 sps:$4 sm:$0xff]  }
 0x220   :  { %3942 = vmatpush1.bf16.msra.mxu0 %v6432_v33  ;;  %v6496_v33 = vld [vmem:[%s8806_s1 + $0xfc0] ss:$8 sps:$4 sm:$0xff]  }
 0x221   :  { %3943 = vmatprep.subr.bf16.mxu0 %v6437_v47  ;;  %v6499_v47 = vld [vmem:[%s8806_s1 + $0xfd0] ss:$8 sps:$4 sm:$0xff]  }
 0x224   :  { %3944 = vmatpush1.bf16.msra.mxu0 %v6435_v18  ;;  %v6502_v18 = vld [vmem:[%s8806_s1 + $0xfe0] ss:$8 sps:$4 sm:$0xff]  }
 0x225   :  { %3945 = vmatprep.subr.bf16.mxu0 %v6440_v50  ;;  %v6505_v50 = vld [vmem:[%s8806_s1 + $0xff0] ss:$8 sps:$4 sm:$0xff]  }
 0x228   :  { %3946 = vmatpush1.bf16.msra.mxu0 %v6438_v53  ;;  %v6552_v53 = vld [vmem:[%s8808_s3 + $0x154] ss:$12 sps:$4 sm:$0xff]  }
 0x229   :  { %3947 = vmatprep.subr.bf16.mxu0 %v6443_v55  ;;  %4378 = vmatprep.subr.bf16.mxu1 %v6552_v53  ;;  %v6555_v55 = vld [vmem:[%s8808_s3 + $0x16c] ss:$12 sps:$4 sm:$0xff]   ;;  %v6613_v53 = vld [vmem:[%s8809_s5 + $0xd4] ss:$8 sps:$4 sm:$0xff]  }
 0x22a   :  { %4379 = vmatpush1.bf16.msra.mxu1 %v6550_v54  ;;  %v6611_v54 = vld [vmem:[%s8809_s5 + $0xd0] ss:$8 sps:$4 sm:$0xff]  }
 0x22b   :  { %4380 = vmatprep.subr.bf16.mxu1 %v6555_v55  ;;  %v6616_v55 = vld [vmem:[%s8809_s5 + $0xe4] ss:$8 sps:$4 sm:$0xff]  }
 0x22c   :  { %3948 = vmatpush1.bf16.msra.mxu0 %v6441_v57  ;;  %v6556_v57 = vld [vmem:[%s8808_s3 + $0xc8] ss:$12 sps:$4 sm:$0xff]  }
 0x22d   :  { %3949 = vmatprep.subr.bf16.mxu0 %v6446_v62  ;;  %v549_v62 = vld [vmem:[%s8810_s2] sm:$0x3] }
 0x22e   :  { %4381 = vmatpush1.bf16.msra.mxu1 %v6553_v56  ;;  %v558_v35 = vrot.slane %v549_v62, %v8532_v63  ;;  %v6614_v56 = vld [vmem:[%s8809_s5 + $0xe0] ss:$8 sps:$4 sm:$0xff]  }
 0x22f   :  { %5646 = vmatprep.subr.bf16.mxu1 %v6556_v57  ;;  %v6619_v57 = vld [vmem:[%s8809_s5 + $0xf4] ss:$8 sps:$4 sm:$0xff]  }
 0x230   :  { %3950 = vmatpush1.bf16.msra.mxu0 %v6444_v22  ;;  %v554_v22 = vrot.slane %v549_v62, %v8526_v43  ;;  %v6617_v62 = vld [vmem:[%s8809_s5 + $0xf0] ss:$8 sps:$4 sm:$0xff]  }
 0x231   :  { %3951 = vmatprep.subr.bf16.mxu0 %v6449_v0 }
 0x234   :  { %3952 = vmatpush1.bf16.msra.mxu0 %v6447_v2 }
 0x235   :  { %3953 = vmatprep.subr.bf16.mxu0 %v6452_v58 }
 0x238   :  { %3954 = vmatpush1.bf16.msra.mxu0 %v6450_v4 }
 0x239   :  { %3955 = vmatprep.subr.bf16.mxu0 %v6455_v6 }
 0x23c   :  { %3956 = vmatpush1.bf16.msra.mxu0 %v6453_v7 }
 0x23d   :  { %3957 = vmatprep.subr.bf16.mxu0 %v6458_v8 }
 0x240   :  { %3958 = vmatpush1.bf16.msra.mxu0 %v6456_v9  ;;  %v6558_v9 = vld [vmem:[%s8808_s3 + $0xe0] ss:$12 sps:$4 sm:$0xff]  }
 0x241   :  { %3968 = vmatprep.subr.bf16.mxu0 %v6462_v10  ;;  %v6559_v10 = vld [vmem:[%s8808_s3 + $0x20] ss:$12 sps:$4 sm:$0xff]  }
 0x243   :  { %3960 = vmatmul.mubr.bf16.vlgmr.msra.gmra.mrb[0].mxu0 %v8406_v11  ;;  %v6560_v11 = vld [vmem:[%s8808_s3 + $0xf8] ss:$12 sps:$4 sm:$0xff]  }
 0x244   :  { %3969 = vmatpush1.bf16.msra.mxu0 %v6460_v13  ;;  %4000 = vmatprep.mubr.bf16.mxu0 %v760_v14  ;;  %v6561_v13 = vld [vmem:[%s8808_s3 + $0x38] ss:$12 sps:$4 sm:$0xff]   ;;  %v6562_v14 = vld [vmem:[%s8808_s3 + $0x110] ss:$12 sps:$4 sm:$0xff]  }
 0x245   :  { %3970 = vmatprep.subr.bf16.mxu0 %v6465_v15  ;;  %v6563_v15 = vld [vmem:[%s8808_s3 + $0x50] ss:$12 sps:$4 sm:$0xff]  }
 0x248   :  { %3971 = vmatpush1.bf16.msra.mxu0 %v6463_v49  ;;  %v6564_v49 = vld [vmem:[%s8808_s3 + $0x128] ss:$12 sps:$4 sm:$0xff]  }
 0x249   :  { %3972 = vmatprep.subr.bf16.mxu0 %v6468_v61  ;;  %v6565_v61 = vld [vmem:[%s8808_s3 + $0x68] ss:$12 sps:$4 sm:$0xff]  }
 0x24c   :  { %3973 = vmatpush1.bf16.msra.mxu0 %v6466_v12  ;;  %v6566_v12 = vld [vmem:[%s8808_s3 + $0x140] ss:$12 sps:$4 sm:$0xff]  }
 0x24d   :  { %3974 = vmatprep.subr.bf16.mxu0 %v6471_v16  ;;  %v6567_v16 = vld [vmem:[%s8808_s3 + $0x80] ss:$12 sps:$4 sm:$0xff]  }
 0x250   :  { %3975 = vmatpush1.bf16.msra.mxu0 %v6469_v19  ;;  %v6568_v19 = vld [vmem:[%s8808_s3 + $0x158] ss:$12 sps:$4 sm:$0xff]  }
 0x251   :  { %3976 = vmatprep.subr.bf16.mxu0 %v6474_v20  ;;  %v6569_v20 = vld [vmem:[%s8808_s3 + $0x98] ss:$12 sps:$4 sm:$0xff]  }
 0x254   :  { %3977 = vmatpush1.bf16.msra.mxu0 %v6472_v21  ;;  %v6570_v21 = vld [vmem:[%s8808_s3 + $0x170] ss:$12 sps:$4 sm:$0xff]  }
 0x255   :  { %3978 = vmatprep.subr.bf16.mxu0 %v6477_v52  ;;  %v8447_v25 = vpop.f32.mrb[0].mxu1  ;;  %v6571_v52 = vld [vmem:[%s8808_s3 + $0xb0] ss:$12 sps:$4 sm:$0xff]  }
 0x256   :  { %v8449_v26 = vpop.f32.mrb[1].mxu1  ;;  %v5668_v0 = vadd.f32 %v8447_v25, %v554_v22  ;;  %v6577_v25 = vld [vmem:[%s8809_s5 + $0x14] ss:$8 sps:$4 sm:$0xff]   ;;  %v6622_v22 = vld [vmem:[%s8809_s5 + $0x104] ss:$8 sps:$4 sm:$0xff]  }
 0x257   :  { %v3596_v27 = vpop.f32.mrb[2].mxu1  ;;  %v5670_v1 = vadd.f32 %v8449_v26, %v558_v35  ;;  %v6575_v26 = vld [vmem:[%s8809_s5 + $0x10] ss:$8 sps:$4 sm:$0xff]   ;;  %v4077_v35 = vld [vmem:[%s8812_s4] sm:$0x7] }
 0x258   :  { %3979 = vmatpush1.bf16.msra.mxu0 %v6475_v23  ;;  %v3597_v29 = vpop.f32.mrb[3].mxu1  ;;  %v6574_v23 = vld [vmem:[%s8809_s5 + $0x4] ss:$8 sps:$4 sm:$0xff]  }
 0x259   :  { %3980 = vmatprep.subr.bf16.mxu0 %v6480_v24  ;;  %v6572_v24 = vld [vmem:[%s8809_s5] ss:$8 sps:$4 sm:$0xff]   ;;  %v6580_v27 = vld [vmem:[%s8809_s5 + $0x24] ss:$8 sps:$4 sm:$0xff]   ;;  %v6583_v29 = vld [vmem:[%s8809_s5 + $0x34] ss:$8 sps:$4 sm:$0xff]  }
 0x25c   :  { %3981 = vmatpush1.bf16.msra.mxu0 %v6478_v28  ;;  %v6578_v28 = vld [vmem:[%s8809_s5 + $0x20] ss:$8 sps:$4 sm:$0xff]  }
 0x25d   :  { %3982 = vmatprep.subr.bf16.mxu0 %v6483_v30  ;;  %v6581_v30 = vld [vmem:[%s8809_s5 + $0x30] ss:$8 sps:$4 sm:$0xff]  }
 0x260   :  { %3983 = vmatpush1.bf16.msra.mxu0 %v6481_v31  ;;  %v6586_v31 = vld [vmem:[%s8809_s5 + $0x44] ss:$8 sps:$4 sm:$0xff]  }
 0x261   :  { %3984 = vmatprep.subr.bf16.mxu0 %v6486_v32  ;;  %v6584_v32 = vld [vmem:[%s8809_s5 + $0x40] ss:$8 sps:$4 sm:$0xff]  }
 0x264   :  { %3985 = vmatpush1.bf16.msra.mxu0 %v6484_v17  ;;  %v6589_v17 = vld [vmem:[%s8809_s5 + $0x54] ss:$8 sps:$4 sm:$0xff]  }
 0x265   :  { %3986 = vmatprep.subr.bf16.mxu0 %v6489_v34  ;;  %v6587_v34 = vld [vmem:[%s8809_s5 + $0x50] ss:$8 sps:$4 sm:$0xff]  }
 0x268   :  { %3987 = vmatpush1.bf16.msra.mxu0 %v6487_v36  ;;  %v6592_v36 = vld [vmem:[%s8809_s5 + $0x64] ss:$8 sps:$4 sm:$0xff]  }
 0x269   :  { %3988 = vmatprep.subr.bf16.mxu0 %v6492_v37  ;;  %v6590_v37 = vld [vmem:[%s8809_s5 + $0x60] ss:$8 sps:$4 sm:$0xff]  }
 0x26c   :  { %3989 = vmatpush1.bf16.msra.mxu0 %v6490_v38  ;;  %v6595_v38 = vld [vmem:[%s8809_s5 + $0x74] ss:$8 sps:$4 sm:$0xff]  }
 0x26d   :  { %3990 = vmatprep.subr.bf16.mxu0 %v6495_v39  ;;  %v6593_v39 = vld [vmem:[%s8809_s5 + $0x70] ss:$8 sps:$4 sm:$0xff]  }
 0x270   :  { %3991 = vmatpush1.bf16.msra.mxu0 %v6493_v44  ;;  %v6598_v44 = vld [vmem:[%s8809_s5 + $0x84] ss:$8 sps:$4 sm:$0xff]  }
 0x271   :  { %3992 = vmatprep.subr.bf16.mxu0 %v6498_v45  ;;  %v6596_v45 = vld [vmem:[%s8809_s5 + $0x80] ss:$8 sps:$4 sm:$0xff]  }
 0x274   :  { %3993 = vmatpush1.bf16.msra.mxu0 %v6496_v33  ;;  %v6601_v33 = vld [vmem:[%s8809_s5 + $0x94] ss:$8 sps:$4 sm:$0xff]  }
 0x275   :  { %3994 = vmatprep.subr.bf16.mxu0 %v6501_v46  ;;  %v6599_v46 = vld [vmem:[%s8809_s5 + $0x90] ss:$8 sps:$4 sm:$0xff]  }
 0x278   :  { %3995 = vmatpush1.bf16.msra.mxu0 %v6499_v47  ;;  %v6604_v47 = vld [vmem:[%s8809_s5 + $0xa4] ss:$8 sps:$4 sm:$0xff]  }
 0x279   :  { %3996 = vmatprep.subr.bf16.mxu0 %v6504_v48  ;;  %v6602_v48 = vld [vmem:[%s8809_s5 + $0xa0] ss:$8 sps:$4 sm:$0xff]  }
 0x27c   :  { %3997 = vmatpush1.bf16.msra.mxu0 %v6502_v18  ;;  %v6607_v18 = vld [vmem:[%s8809_s5 + $0xb4] ss:$8 sps:$4 sm:$0xff]  }
 0x27d   :  { %3998 = vmatprep.subr.bf16.mxu0 %v6507_v41  ;;  %v6605_v41 = vld [vmem:[%s8809_s5 + $0xb0] ss:$8 sps:$4 sm:$0xff]  }
 0x280   :  { %3999 = vmatpush1.bf16.msra.mxu0 %v6505_v50  ;;  %v6610_v50 = vld [vmem:[%s8809_s5 + $0xc4] ss:$8 sps:$4 sm:$0xff]  }
 0x283   :  { %4001 = vmatmul.mubr.bf16.vlgmr.msra.gmra.mrb[0].mxu0 %v758_v51  ;;  %v6608_v51 = vld [vmem:[%s8809_s5 + $0xc0] ss:$8 sps:$4 sm:$0xff]  }
 0x356   :  { %v4002_v2 = vpop.f32.mrb[0].mxu0 }
 0x357   :  { %v5669_v3 = vadd.f32 %v5668_v0, %v4002_v2  ;;  %v4004_v58 = vpop.f32.mrb[1].mxu0  ;;  %v4082_v0 = vrot.slane %v4077_v35, %v8526_v43 }
 0x358   :  { %v5671_v59 = vadd.f32 %v5670_v1, %v4004_v58  ;;  %v4006_v4 = vpop.f32.mrb[2].mxu0  ;;  %v4086_v1 = vrot.slane %v4077_v35, %v8532_v63 }
 0x359   :  { %v4009_v5 = vmax.f32 %v5669_v3, 0.0  ;;  %v4007_v6 = vpop.f32.mrb[3].mxu0 }
 0x35a   :  { %v4010_v60 = vmax.f32 %v5671_v59, 0.0 }
 0x35b   :  { %v4011_v8 = vpack.c.bf16 %v4009_v5, %v4009_v5 }
 0x35c   :  { %v4012_v7 = vpack.c.bf16 %v4010_v60, %v4010_v60 }
 0x35e   :  { %4382 = vmatprep.mubr.bf16.mxu1 %v4012_v7 }
 0x35f   :  { %4383 = vmatmul.mubr.bf16.vlgmr.msra.gmra.mrb[4].mxu1 %v4011_v8 }
 0x360   :  { %5647 = vmatpush3.bf16.msra.mxu1 %v6557_v40  ;;  %4423 = vmatprep.mubr.bf16.mxu1 %v4012_v7  ;;  %v6620_v40 = vld [vmem:[%s8809_s5 + $0x100] ss:$8 sps:$4 sm:$0xff]  }
 0x361   :  { %5648 = vmatprep.subr.bf16.mxu1 %v6558_v9  ;;  %v6625_v9 = vld [vmem:[%s8809_s5 + $0x114] ss:$8 sps:$4 sm:$0xff]  }
 0x364   :  { %5649 = vmatpush3.bf16.msra.mxu1 %v6559_v10  ;;  %v6623_v10 = vld [vmem:[%s8809_s5 + $0x110] ss:$8 sps:$4 sm:$0xff]  }
 0x365   :  { %5650 = vmatprep.subr.bf16.mxu1 %v6560_v11  ;;  %v6677_v11 = vmov 0  }
 0x368   :  { %5651 = vmatpush3.bf16.msra.mxu1 %v6561_v13  ;;  %v6628_v13 = vld [vmem:[%s8811_s7 + $0x4] ss:$8 sps:$4 sm:$0xff]  }
 0x369   :  { %5652 = vmatprep.subr.bf16.mxu1 %v6562_v14  ;;  %v4089_v14 = vsub.s32 2, %v6845_v42  ;;  %v6629_v42 = vld [vmem:[%s8811_s7 + $0x10] ss:$8 sps:$4 sm:$0xff]  }
 0x36c   :  { %5653 = vmatpush3.bf16.msra.mxu1 %v6563_v15 }
 0x36d   :  { %5654 = vmatprep.subr.bf16.mxu1 %v6564_v49  ;;  %v4090_v49 = vrot.slane %v4077_v35, %v4089_v14 }
 0x370   :  { %5655 = vmatpush3.bf16.msra.mxu1 %v6565_v61 }
 0x371   :  { %5656 = vmatprep.subr.bf16.mxu1 %v6566_v12 }
 0x374   :  { %5657 = vmatpush3.bf16.msra.mxu1 %v6567_v16 }
 0x375   :  { %5658 = vmatprep.subr.bf16.mxu1 %v6568_v19 }
 0x378   :  { %5659 = vmatpush3.bf16.msra.mxu1 %v6569_v20 }
 0x379   :  { %5660 = vmatprep.subr.bf16.mxu1 %v6570_v21 }
 0x37c   :  { %5661 = vmatpush3.bf16.msra.mxu1 %v6571_v52  ;;  %v6626_v52 = vld [vmem:[%s8811_s7] ss:$8 sps:$4 sm:$0xff]  }
 0x37d   :  { %4669 = vmatprep.subr.bf16.mxu1 %v6574_v23 }
 0x37f   :  { %4424 = vmatmul.mubr.bf16.vlgmr.msra.gmra.mrb[8].mxu1 %v4011_v8 }
 0x380   :  { %4670 = vmatpush1.bf16.msra.mxu1 %v6572_v24  ;;  %v6631_v24 = vld [vmem:[%s8811_s7 + $0x14] ss:$8 sps:$4 sm:$0xff]  }
 0x381   :  { %4671 = vmatprep.subr.bf16.mxu1 %v6577_v25  ;;  %v6634_v25 = vld [vmem:[%s8811_s7 + $0x24] ss:$8 sps:$4 sm:$0xff]  }
 0x384   :  { %4672 = vmatpush1.bf16.msra.mxu1 %v6575_v26  ;;  %v6632_v26 = vld [vmem:[%s8811_s7 + $0x20] ss:$8 sps:$4 sm:$0xff]  }
 0x385   :  { %4673 = vmatprep.subr.bf16.mxu1 %v6580_v27  ;;  %v6637_v27 = vld [vmem:[%s8811_s7 + $0x34] ss:$8 sps:$4 sm:$0xff]  }
 0x388   :  { %4674 = vmatpush1.bf16.msra.mxu1 %v6578_v28  ;;  %v6635_v28 = vld [vmem:[%s8811_s7 + $0x30] ss:$8 sps:$4 sm:$0xff]  }
 0x389   :  { %4675 = vmatprep.subr.bf16.mxu1 %v6583_v29  ;;  %v6640_v29 = vld [vmem:[%s8811_s7 + $0x44] ss:$8 sps:$4 sm:$0xff]  }
 0x38c   :  { %4676 = vmatpush1.bf16.msra.mxu1 %v6581_v30  ;;  %v6638_v30 = vld [vmem:[%s8811_s7 + $0x40] ss:$8 sps:$4 sm:$0xff]  }
 0x38d   :  { %4677 = vmatprep.subr.bf16.mxu1 %v6586_v31  ;;  %v6643_v31 = vld [vmem:[%s8811_s7 + $0x54] ss:$8 sps:$4 sm:$0xff]  }
 0x390   :  { %4678 = vmatpush1.bf16.msra.mxu1 %v6584_v32  ;;  %v6641_v32 = vld [vmem:[%s8811_s7 + $0x50] ss:$8 sps:$4 sm:$0xff]  }
 0x391   :  { %4679 = vmatprep.subr.bf16.mxu1 %v6589_v17  ;;  %v6646_v17 = vld [vmem:[%s8811_s7 + $0x64] ss:$8 sps:$4 sm:$0xff]  }
 0x394   :  { %4680 = vmatpush1.bf16.msra.mxu1 %v6587_v34  ;;  %v6644_v34 = vld [vmem:[%s8811_s7 + $0x60] ss:$8 sps:$4 sm:$0xff]  }
 0x395   :  { %4681 = vmatprep.subr.bf16.mxu1 %v6592_v36  ;;  %v6649_v36 = vld [vmem:[%s8811_s7 + $0x74] ss:$8 sps:$4 sm:$0xff]  }
 0x398   :  { %4682 = vmatpush1.bf16.msra.mxu1 %v6590_v37  ;;  %v6647_v37 = vld [vmem:[%s8811_s7 + $0x70] ss:$8 sps:$4 sm:$0xff]  }
 0x399   :  { %4683 = vmatprep.subr.bf16.mxu1 %v6595_v38  ;;  %v6652_v38 = vld [vmem:[%s8811_s7 + $0x84] ss:$8 sps:$4 sm:$0xff]  }
 0x39c   :  { %4684 = vmatpush1.bf16.msra.mxu1 %v6593_v39  ;;  %v6650_v39 = vld [vmem:[%s8811_s7 + $0x80] ss:$8 sps:$4 sm:$0xff]  }
 0x39d   :  { %4685 = vmatprep.subr.bf16.mxu1 %v6598_v44  ;;  %v6655_v44 = vld [vmem:[%s8811_s7 + $0x94] ss:$8 sps:$4 sm:$0xff]  }
 0x3a0   :  { %4686 = vmatpush1.bf16.msra.mxu1 %v6596_v45  ;;  %v6653_v45 = vld [vmem:[%s8811_s7 + $0x90] ss:$8 sps:$4 sm:$0xff]  }
 0x3a1   :  { %4687 = vmatprep.subr.bf16.mxu1 %v6601_v33  ;;  %v6658_v33 = vld [vmem:[%s8811_s7 + $0xa4] ss:$8 sps:$4 sm:$0xff]  }
 0x3a4   :  { %4688 = vmatpush1.bf16.msra.mxu1 %v6599_v46  ;;  %v6656_v46 = vld [vmem:[%s8811_s7 + $0xa0] ss:$8 sps:$4 sm:$0xff]  }
 0x3a5   :  { %4689 = vmatprep.subr.bf16.mxu1 %v6604_v47  ;;  %v6661_v47 = vld [vmem:[%s8811_s7 + $0xb4] ss:$8 sps:$4 sm:$0xff]  }
 0x3a8   :  { %4690 = vmatpush1.bf16.msra.mxu1 %v6602_v48  ;;  %v6659_v48 = vld [vmem:[%s8811_s7 + $0xb0] ss:$8 sps:$4 sm:$0xff]  }
 0x3a9   :  { %4691 = vmatprep.subr.bf16.mxu1 %v6607_v18  ;;  %v6664_v18 = vld [vmem:[%s8811_s7 + $0xc4] ss:$8 sps:$4 sm:$0xff]  }
 0x3ac   :  { %4692 = vmatpush1.bf16.msra.mxu1 %v6605_v41  ;;  %v6662_v41 = vld [vmem:[%s8811_s7 + $0xc0] ss:$8 sps:$4 sm:$0xff]  }
 0x3ad   :  { %4693 = vmatprep.subr.bf16.mxu1 %v6610_v50  ;;  %v6667_v50 = vld [vmem:[%s8811_s7 + $0xd4] ss:$8 sps:$4 sm:$0xff]  }
 0x3b0   :  { %4694 = vmatpush1.bf16.msra.mxu1 %v6608_v51  ;;  %v6665_v51 = vld [vmem:[%s8811_s7 + $0xd0] ss:$8 sps:$4 sm:$0xff]  }
 0x3b1   :  { %4695 = vmatprep.subr.bf16.mxu1 %v6613_v53  ;;  %v6670_v53 = vld [vmem:[%s8811_s7 + $0xe4] ss:$8 sps:$4 sm:$0xff]  }
 0x3b4   :  { %4696 = vmatpush1.bf16.msra.mxu1 %v6611_v54  ;;  %v6668_v54 = vld [vmem:[%s8811_s7 + $0xe0] ss:$8 sps:$4 sm:$0xff]  }
 0x3b5   :  { %4697 = vmatprep.subr.bf16.mxu1 %v6616_v55  ;;  %v6673_v55 = vld [vmem:[%s8811_s7 + $0xf4] ss:$8 sps:$4 sm:$0xff]  }
 0x3b8   :  { %4698 = vmatpush1.bf16.msra.mxu1 %v6614_v56  ;;  %v6671_v56 = vld [vmem:[%s8811_s7 + $0xf0] ss:$8 sps:$4 sm:$0xff]  }
 0x3b9   :  { %4699 = vmatprep.subr.bf16.mxu1 %v6619_v57  ;;  %v4473_v57 = vld [vmem:[%s8813_s6] sm:$0x3] }
 0x3bc   :  { %4700 = vmatpush1.bf16.msra.mxu1 %v6617_v62  ;;  %v4478_v62 = vrot.slane %v4473_v57, %v8526_v43 }
 0x3bd   :  { %4710 = vmatprep.subr.bf16.mxu1 %v6622_v22  ;;  %v4482_v22 = vrot.slane %v4473_v57, %v8532_v63 }
 0x432   :  { %v4384_v2 = vpop.f32.mrb[4].mxu1 }
 0x433   :  { %v4385_v3 = vadd.f32 %v4384_v2, %v4082_v0  ;;  %v4386_v58 = vpop.f32.mrb[5].mxu1 }
 0x434   :  { %v4387_v59 = vadd.f32 %v4386_v58, %v4086_v1  ;;  %v4388_v4 = vpop.f32.mrb[6].mxu1 }
 0x435   :  { %v4431_v5 = vmax.f32 %v4385_v3, 0.0  ;;  %v4389_v6 = vpop.f32.mrb[7].mxu1 }
 0x436   :  { %v4432_v60 = vmax.f32 %v4387_v59, 0.0 }
 0x437   :  { %v4434_v8 = vpack.c.bf16 %v4431_v5, %v4431_v5 }
 0x438   :  { %v4435_v7 = vpack.c.bf16 %v4432_v60, %v4432_v60  ;;  %v4787_v60 = vld [vmem:[%s8814_s8] sm:$0x3] }
 0x43a   :  { %4701 = vmatprep.mubr.bf16.mxu1 %v4435_v7  ;;  %v4792_v7 = vrot.slane %v4787_v60, %v8526_v43 }
 0x43b   :  { %4702 = vmatmul.mubr.bf16.vlgmr.msra.gmra.mrb[12].mxu1 %v4434_v8 }
 0x43c   :  { %4711 = vmatpush1.bf16.msra.mxu1 %v6620_v40  ;;  %4742 = vmatprep.mubr.bf16.mxu1 %v6677_v11  ;;  %v4796_v40 = vrot.slane %v4787_v60, %v8532_v63 }
 0x43d   :  { %4712 = vmatprep.subr.bf16.mxu1 %v6625_v9 }
 0x440   :  { %4713 = vmatpush1.bf16.msra.mxu1 %v6623_v10 }
 0x441   :  { %4959 = vmatprep.subr.bf16.mxu1 %v6628_v13 }
 0x452   :  { %v5662_v15 = vpop.f32.mrb[8].mxu1 }
 0x453   :  { %v5663_v61 = vpop.f32.mrb[9].mxu1 }
 0x454   :  { %v5664_v12 = vadd.f32 %v5663_v61, %v5662_v15  ;;  %v5665_v16 = vpop.f32.mrb[10].mxu1 }
 0x455   :  { %v5666_v19 = vpop.f32.mrb[11].mxu1 }
 0x456   :  { %v4426_v20 = vadd.f32 %v5664_v12, %v4090_v49 }
 0x458   :  { %v4433_v21 = vmax.f32 %v4426_v20, 0.0 }
 0x45a   :  { %v4436_v23 = vpack.c.bf16 %v4433_v21, %v4433_v21 }
 0x45c   :  { %5612 = vmatmul.mubr.msk.bf16.vlgmr.msra.gmra.mrb[12].mxu1 %vm4665_vm0, %v4436_v23 }
 0x45d   :  { %4960 = vmatpush1.bf16.msra.mxu1 %v6626_v52 }
 0x45e   :  { %4961 = vmatprep.subr.bf16.mxu1 %v6631_v24 }
 0x461   :  { %4962 = vmatpush1.bf16.msra.mxu1 %v6629_v42 }
 0x462   :  { %4963 = vmatprep.subr.bf16.mxu1 %v6634_v25 }
 0x465   :  { %4964 = vmatpush1.bf16.msra.mxu1 %v6632_v26 }
 0x466   :  { %4965 = vmatprep.subr.bf16.mxu1 %v6637_v27 }
 0x469   :  { %4966 = vmatpush1.bf16.msra.mxu1 %v6635_v28 }
 0x46a   :  { %4967 = vmatprep.subr.bf16.mxu1 %v6640_v29 }
 0x46d   :  { %4968 = vmatpush1.bf16.msra.mxu1 %v6638_v30 }
 0x46e   :  { %4969 = vmatprep.subr.bf16.mxu1 %v6643_v31 }
 0x471   :  { %4970 = vmatpush1.bf16.msra.mxu1 %v6641_v32 }
 0x472   :  { %4971 = vmatprep.subr.bf16.mxu1 %v6646_v17 }
 0x475   :  { %4972 = vmatpush1.bf16.msra.mxu1 %v6644_v34 }
 0x476   :  { %4973 = vmatprep.subr.bf16.mxu1 %v6649_v36 }
 0x479   :  { %4974 = vmatpush1.bf16.msra.mxu1 %v6647_v37 }
 0x47a   :  { %4975 = vmatprep.subr.bf16.mxu1 %v6652_v38 }
 0x47d   :  { %4976 = vmatpush1.bf16.msra.mxu1 %v6650_v39 }
 0x47e   :  { %4977 = vmatprep.subr.bf16.mxu1 %v6655_v44 }
 0x481   :  { %4978 = vmatpush1.bf16.msra.mxu1 %v6653_v45 }
 0x482   :  { %4979 = vmatprep.subr.bf16.mxu1 %v6658_v33 }
 0x485   :  { %4980 = vmatpush1.bf16.msra.mxu1 %v6656_v46 }
 0x486   :  { %4981 = vmatprep.subr.bf16.mxu1 %v6661_v47 }
 0x489   :  { %4982 = vmatpush1.bf16.msra.mxu1 %v6659_v48 }
 0x48a   :  { %4983 = vmatprep.subr.bf16.mxu1 %v6664_v18 }
 0x48d   :  { %4984 = vmatpush1.bf16.msra.mxu1 %v6662_v41 }
 0x48e   :  { %4985 = vmatprep.subr.bf16.mxu1 %v6667_v50 }
 0x491   :  { %4986 = vmatpush1.bf16.msra.mxu1 %v6665_v51 }
 0x492   :  { %4987 = vmatprep.subr.bf16.mxu1 %v6670_v53 }
 0x495   :  { %4988 = vmatpush1.bf16.msra.mxu1 %v6668_v54 }
 0x496   :  { %4989 = vmatprep.subr.bf16.mxu1 %v6673_v55 }
 0x499   :  { %4990 = vmatpush1.bf16.msra.mxu1 %v6671_v56 }
 0x52f   :  { %v4744_v35 = vpop.f32.mrb[12].mxu1 }
 0x530   :  { %v5672_v0 = vadd.f32 %v4744_v35, %v4478_v62  ;;  %v4746_v1 = vpop.f32.mrb[13].mxu1 }
 0x531   :  { %v5673_v2 = vadd.f32 %v4746_v1, %v4482_v22  ;;  %v4748_v3 = vpop.f32.mrb[14].mxu1 }
 0x532   :  { %v4751_v58 = vmax.f32 %v5672_v0, 0.0  ;;  %v4749_v59 = vpop.f32.mrb[15].mxu1 }
 0x533   :  { %v4752_v4 = vmax.f32 %v5673_v2, 0.0 }
 0x534   :  { %v4753_v6 = vpack.c.bf16 %v4751_v58, %v4751_v58 }
 0x535   :  { %v4754_v5 = vpack.c.bf16 %v4752_v4, %v4752_v4 }
 0x537   :  { %4991 = vmatprep.mubr.bf16.mxu1 %v4754_v5 }
 0x538   :  { %4992 = vmatmul.mubr.bf16.vlgmr.msra.gmra.mrb[16].mxu1 %v4753_v6 }
 0x60b   :  { %v4993_v8 = vpop.f32.mrb[16].mxu1 }
 0x60c   :  { %v4994_v9 = vadd.f32 %v4993_v8, %v4792_v7  ;;  %v4995_v10 = vpop.f32.mrb[17].mxu1 }
 0x60d   :  { %v4996_v11 = vadd.f32 %v4995_v10, %v4796_v40  ;;  %v4997_v13 = vpop.f32.mrb[18].mxu1 }
 0x60e   :  { %v4998_v14 = vpop.f32.mrb[19].mxu1 }
 0x60f   :  { %v5002_v15 = vcombine.low %v4994_v9, %v4996_v11 }
 0x611   :  { %5645 = vst.sshfl [vmem:[%s8815_s9] sm:$0x33 pattern:$0x76325410] %v5002_v15 }

</bundles_post_ra>
